<compile_context>
chip_gen: v5e
topology: v5e:2x2
jax: 0.10.0
libtpu: 0.0.40
codegen_flags: <defaults>
</compile_context>

<pallas_src>
import functools

import jax
import jax.numpy as jnp
from jax.experimental import pallas as pl
from jax.experimental.pallas import tpu as pltpu

LANE = 128
SUB = 8
VREG_QUANTUM = SUB * LANE  # 1024 elements


def _largest_tile(total, quantum, cap):
    """Largest multiple of `quantum` that divides `total` and is <= cap."""
    assert total > 0 and total % quantum == 0
    units = total // quantum
    max_units = max(1, cap // quantum)
    best = 1
    for u in range(1, max_units + 1):
        if units % u == 0:
            best = u
    return best * quantum


# --------------------------------------------------------------------------
# Fused pixel-L1 + LPIPS-surrogate kernel.
#
# Grid: (B, L_tiles).  Each step reads a (1, C, RT, 128) block of both videos.
#   acc_p  (RT, 128) f32 : per-sample sum_k sum_l f_k(l)^2  (via Gram trick)
#   acc_l1 (RT, 128) f32 : global sum |x - y|
# Outputs written once (per sample / per kernel) under pl.when(last).
# TODO(synk): real LPIPS uses a pretrained VGG pyramid + learned linear heads;
#             replaced by a deterministic 1x1 linear projection surrogate.
# --------------------------------------------------------------------------
def _lpips_l1_kernel(x_ref, y_ref, perc_ref, l1_ref, acc_p, acc_l1,
                     *, num_ch, gram, compute_l1, compute_perc):
    b = pl.program_id(0)
    lt = pl.program_id(1)
    nb = pl.num_programs(0)
    nl = pl.num_programs(1)

    if compute_l1:
        @pl.when(jnp.logical_and(b == 0, lt == 0))
        def _():
            acc_l1[...] = jnp.zeros_like(acc_l1)

    if compute_perc:
        @pl.when(lt == 0)
        def _():
            acc_p[...] = jnp.zeros_like(acc_p)

    x = x_ref[0].astype(jnp.float32)   # (C, RT, LANE)
    y = y_ref[0].astype(jnp.float32)
    d = x - y                          # (C, RT, LANE)

    if compute_l1:
        acc_l1[...] += jnp.sum(jnp.abs(d), axis=0)     # VPU adds over C slabs

    if compute_perc:
        # sum_k f_k^2 = sum_{c,c'} G[c,c'] d_c d_{c'}   (channels as scalars)
        sq = None
        for c in range(num_ch):
            dc = d[c]
            term = gram[c][c] * dc * dc
            sq = term if sq is None else sq + term
            for c2 in range(c + 1, num_ch):
                sq = sq + (2.0 * gram[c][c2]) * dc * d[c2]
        acc_p[...] += sq

        @pl.when(lt == nl - 1)
        def _():
            perc_ref[...] = jnp.full(perc_ref.shape, jnp.sum(acc_p[...]),
                                     dtype=perc_ref.dtype)

    if compute_l1:
        @pl.when(jnp.logical_and(b == nb - 1, lt == nl - 1))
        def _():
            l1_ref[...] = jnp.full(l1_ref.shape, jnp.sum(acc_l1[...]),
                                   dtype=l1_ref.dtype)


def lpips_l1_fused(x, y, gram, *, feat_dim, compute_l1, compute_perc):
    """Returns (per-sample perceptual mean (B,), global L1 sum scalar)."""
    B, C, T, H, W = x.shape
    L = T * H * W
    xf = x.reshape(B, C, L).astype(jnp.float32)
    yf = y.reshape(B, C, L).astype(jnp.float32)
    Lp = ((L + VREG_QUANTUM - 1) // VREG_QUANTUM) * VREG_QUANTUM
    if Lp != L:
        # zero padding contributes 0 to both sums; denominators use true L.
        pad = Lp - L
        xf = jnp.pad(xf, ((0, 0), (0, 0), (0, pad)))
        yf = jnp.pad(yf, ((0, 0), (0, 0), (0, pad)))
    R = Lp // LANE                       # number of 128-lane rows, multiple of 8
    RT = _largest_tile(R, SUB, 1024)     # rows per block (<= 512 KiB/channel)
    x4 = xf.reshape(B, C, R, LANE)
    y4 = yf.reshape(B, C, R, LANE)
    n_lt = R // RT

    kernel = functools.partial(
        _lpips_l1_kernel, num_ch=C, gram=gram,
        compute_l1=compute_l1, compute_perc=compute_perc)

    perc_out, l1_out = pl.pallas_call(
        kernel,
        out_shape=(jax.ShapeDtypeStruct((B, SUB, LANE), jnp.float32),
                   jax.ShapeDtypeStruct((SUB, LANE), jnp.float32)),
        grid_spec=pltpu.PrefetchScalarGridSpec(
            num_scalar_prefetch=0,
            grid=(B, n_lt),
            in_specs=[
                pl.BlockSpec((1, C, RT, LANE), lambda b, l: (b, 0, l, 0)),
                pl.BlockSpec((1, C, RT, LANE), lambda b, l: (b, 0, l, 0)),
            ],
            out_specs=[
                pl.BlockSpec((1, SUB, LANE), lambda b, l: (b, 0, 0)),
                pl.BlockSpec((SUB, LANE), lambda b, l: (0, 0)),
            ],
            scratch_shapes=[
                pltpu.VMEM((RT, LANE), jnp.float32),   # acc_p
                pltpu.VMEM((RT, LANE), jnp.float32),   # acc_l1
            ],
        ),
        compiler_params=pltpu.CompilerParams(
            dimension_semantics=("arbitrary", "arbitrary")),
    )(x4, y4)

    perc_per_sample = perc_out[:, 0, 0] / jnp.float32(L * feat_dim)   # (B,)
    l1_sum = l1_out[0, 0]
    return perc_per_sample, l1_sum


# --------------------------------------------------------------------------
# InceptionI3d surrogate + FVD statistics, fused.
#
# Grid: (K_tiles,) over the flattened video dim D.  Each step does two bf16
# MXU matmuls (real, rec) against the SAME streamed weight tile, accumulating
# f32 features in VMEM scratch.  The last step computes mu / cov losses.
# TODO(synk): real InceptionI3d backbone (3-D convs) has no in-script
#             equivalent; a deterministic linear projection is used instead.
# TODO(synk): exact unnormalize() stats of the repo unknown; assuming
#             [-1, 1] -> [0, 1].
# --------------------------------------------------------------------------
def _fvd_kernel(xr_ref, xc_ref, w_ref, mu_ref, cov_ref, acc_r, acc_c, *, batch):
    k = pl.program_id(0)
    nk = pl.num_programs(0)

    @pl.when(k == 0)
    def _():
        acc_r[...] = jnp.zeros_like(acc_r)
        acc_c[...] = jnp.zeros_like(acc_c)

    xr = ((xr_ref[...] + 1.0) * 0.5).astype(jnp.bfloat16)
    xc = ((xc_ref[...] + 1.0) * 0.5).astype(jnp.bfloat16)
    w = w_ref[...]
    acc_r[...] += jnp.dot(xr, w, preferred_element_type=jnp.float32)
    acc_c[...] += jnp.dot(xc, w, preferred_element_type=jnp.float32)

    @pl.when(k == nk - 1)
    def _():
        fr = acc_r[...]                                    # (B, F) f32
        fc = acc_c[...]
        mu_r = jnp.mean(fr, axis=0, keepdims=True)         # (1, F)
        mu_c = jnp.mean(fc, axis=0, keepdims=True)
        md = mu_r - mu_c
        mu_loss = jnp.mean(md * md)
        cen_r = fr - mu_r
        cen_c = fc - mu_c
        denom = float(max(batch - 1, 1))
        dn = (((0,), (0,)), ((), ()))                       # contract over B
        cov_r = jax.lax.dot_general(cen_r, cen_r, dn,
                                    preferred_element_type=jnp.float32) / denom
        cov_c = jax.lax.dot_general(cen_c, cen_c, dn,
                                    preferred_element_type=jnp.float32) / denom
        cd = cov_r - cov_c
        cov_loss = jnp.mean(cd * cd)
        mu_ref[...] = jnp.full(mu_ref.shape, mu_loss, dtype=mu_ref.dtype)
        cov_ref[...] = jnp.full(cov_ref.shape, cov_loss, dtype=cov_ref.dtype)


def fvd_losses(real, rec, w_bf16):
    """Returns (fvd_mu_loss, fvd_cov_loss) scalars."""
    B = real.shape[0]
    D = real.size // B
    xr = real.reshape(B, D).astype(jnp.float32)
    xc = rec.reshape(B, D).astype(jnp.float32)
    Dp = ((D + VREG_QUANTUM - 1) // VREG_QUANTUM) * VREG_QUANTUM
    if Dp != D:
        xr = jnp.pad(xr, ((0, 0), (0, Dp - D)))
        xc = jnp.pad(xc, ((0, 0), (0, Dp - D)))
    assert w_bf16.shape[0] == Dp
    F = w_bf16.shape[1]
    # K-tile budget keeps (w tile + x tiles) x double-buffering small enough
    # for v7x's 64 MiB VMEM (and everything older).
    tk = _largest_tile(Dp, LANE, 8192)
    nk = Dp // tk

    mu_out, cov_out = pl.pallas_call(
        functools.partial(_fvd_kernel, batch=B),
        out_shape=(jax.ShapeDtypeStruct((SUB, LANE), jnp.float32),
                   jax.ShapeDtypeStruct((SUB, LANE), jnp.float32)),
        grid_spec=pltpu.PrefetchScalarGridSpec(
            num_scalar_prefetch=0,
            grid=(nk,),
            in_specs=[
                pl.BlockSpec((B, tk), lambda k: (0, k)),
                pl.BlockSpec((B, tk), lambda k: (0, k)),
                pl.BlockSpec((tk, F), lambda k: (k, 0)),
            ],
            out_specs=[
                pl.BlockSpec((SUB, LANE), lambda k: (0, 0)),
                pl.BlockSpec((SUB, LANE), lambda k: (0, 0)),
            ],
            scratch_shapes=[
                pltpu.VMEM((B, F), jnp.float32),
                pltpu.VMEM((B, F), jnp.float32),
            ],
        ),
        compiler_params=pltpu.CompilerParams(
            dimension_semantics=("arbitrary",)),
    )(xr, xc, w_bf16)
    return mu_out[0, 0], cov_out[0, 0]


# --------------------------------------------------------------------------
# VQLoss
# --------------------------------------------------------------------------
class VQLossPallas:
    F_LPIPS = 16
    F_I3D = 128

    def __init__(self, input_shape, codebook_weight=1.0, pixelloss_weight=1.0,
                 perceptual_weight_2d=1.0, fvd_mu_weight=1.0,
                 fvd_cov_weight=1.0):
        self.codebook_weight = codebook_weight
        self.pixel_weight = pixelloss_weight
        self.perceptual_weight_2d = perceptual_weight_2d
        self.fvd_mu_weight = fvd_mu_weight
        self.fvd_cov_weight = fvd_cov_weight

        B, C, T, H, W = input_shape
        D = C * T * H * W
        Dp = ((D + VREG_QUANTUM - 1) // VREG_QUANTUM) * VREG_QUANTUM
        k1, k2 = jax.random.split(jax.random.PRNGKey(42))

        # Deterministic synthetic LPIPS backbone; only its Gram matrix
        # G = W W^T (C x C) is needed by the fused kernel (baked as constants).
        w_lpips = (jax.random.normal(k1, (C, self.F_LPIPS), jnp.float32)
                   / jnp.sqrt(jnp.float32(C)))
        gram = jax.device_get(w_lpips @ w_lpips.T)
        self.gram = tuple(tuple(float(v) for v in row) for row in gram)

        # Deterministic synthetic I3D backbone, zero-padded on K and cast to
        # bf16 for the MXU (f32 accumulation inside the kernel).
        w_i3d = (jax.random.normal(k2, (D, self.F_I3D), jnp.float32)
                 / jnp.sqrt(jnp.float32(D)))
        if Dp != D:
            w_i3d = jnp.pad(w_i3d, ((0, Dp - D), (0, 0)))
        self.w_i3d = w_i3d.astype(jnp.bfloat16)

        self._forward = jax.jit(self._forward_impl)

    # ---------------- forward (jit-ed) ----------------
    def _forward_impl(self, codebook_loss, inputs, reconstructions):
        assert inputs.ndim == 5, (
            f"The FVD metric can be computed only for a batch of videos. "
            f"(input shape: {inputs.shape})")
        B, C, T, H, W = inputs.shape
        numel = inputs.size
        zero = jnp.float32(0.0)

        need_l1 = self.pixel_weight > 0
        need_perc = self.perceptual_weight_2d > 0

        pixel_loss_mean = zero
        perc_2d_mean = zero
        if need_l1 or need_perc:
            perc_per_sample, l1_sum = lpips_l1_fused(
                inputs, reconstructions, self.gram,
                feat_dim=self.F_LPIPS,
                compute_l1=need_l1, compute_perc=need_perc)
            if need_l1:
                pixel_loss_mean = l1_sum / jnp.float32(numel)
            if need_perc:
                perc_2d_mean = jnp.mean(perc_per_sample)

        fvd_loss = zero
        fvd_loss_mu = zero
        fvd_loss_cov = zero
        if self.fvd_mu_weight > 0 or self.fvd_cov_weight > 0:
            fvd_loss_mu, fvd_loss_cov = fvd_losses(inputs, reconstructions,
                                                   self.w_i3d)
            if self.fvd_mu_weight == 0:
                fvd_loss_mu = zero
            if self.fvd_cov_weight == 0:
                fvd_loss_cov = zero
            fvd_loss = (self.fvd_mu_weight * fvd_loss_mu
                        + self.fvd_cov_weight * fvd_loss_cov)

        # rec_loss = pixel_w*|x-y| + perc_w*perc(broadcast) + fvd(broadcast)
        # => rec_loss.mean() decomposes exactly as below.
        rec_loss_mean = (self.pixel_weight * pixel_loss_mean
                         + self.perceptual_weight_2d * perc_2d_mean
                         + fvd_loss)

        codebook_loss = jnp.asarray(codebook_loss, jnp.float32)
        if self.codebook_weight > 0:
            cb_mean = jnp.mean(codebook_loss)
            loss = rec_loss_mean + self.codebook_weight * cb_mean
        else:
            cb_mean = zero
            loss = rec_loss_mean

        log = {
            "total_loss": loss,
            "quant_loss": cb_mean,
            "rec_loss": rec_loss_mean,
            "pixel_loss": pixel_loss_mean,
            "perc_2d_loss": perc_2d_mean,
            "fvd_loss": fvd_loss,
            "fvd_mu_loss": fvd_loss_mu,
            "fvd_cov_loss": fvd_loss_cov,
        }
        return loss, log

    def __call__(self, codebook_loss, inputs, reconstructions):
        return self._forward(codebook_loss, inputs, reconstructions)


if __name__ == "__main__":
    B, C, T, H, W = 2, 3, 4, 16, 16
    key = jax.random.PRNGKey(0)
    k_in, k_noise, k_cb = jax.random.split(key, 3)

    inputs = jax.random.uniform(k_in, (B, C, T, H, W), jnp.float32,
                                minval=-1.0, maxval=1.0)
    reconstructions = jnp.clip(
        inputs + 0.1 * jax.random.normal(k_noise, (B, C, T, H, W),
                                         jnp.float32), -1.0, 1.0)
    codebook_loss = jax.random.uniform(k_cb, (1,), jnp.float32)

    vq_loss = VQLossPallas((B, C, T, H, W))
    loss, log = vq_loss(codebook_loss, inputs, reconstructions)
    jax.block_until_ready(loss)
    print("KERNEL_OK")
</pallas_src>

<mosaic_0001>
module attributes {stable_mosaic.version = 11 : i64} {
  func.func @_lpips_l1_kernel(%arg0: i32, %arg1: i32, %arg2: memref<1x3x8x128xf32, #tpu.memory_space<vmem>>, %arg3: memref<1x3x8x128xf32, #tpu.memory_space<vmem>>, %arg4: memref<1x8x128xf32, #tpu.memory_space<vmem>>, %arg5: memref<8x128xf32, #tpu.memory_space<vmem>>, %arg6: memref<8x128xf32, #tpu.memory_space<vmem>>, %arg7: memref<8x128xf32, #tpu.memory_space<vmem>>) attributes {dimension_semantics = [#tpu.dimension_semantics<arbitrary>, #tpu.dimension_semantics<arbitrary>], iteration_bounds = array<i64: 2, 1>, scalar_prefetch = 0 : i64, scratch_operands = 2 : i64, tpu.core_type = #tpu.core_type<tc>, window_params = [{transform_indices = @transform_0, window_bounds = array<i64: 1, 3, 8, 128>}, {transform_indices = @transform_1, window_bounds = array<i64: 1, 3, 8, 128>}, {transform_indices = @transform_2, window_bounds = array<i64: 1, 8, 128>}, {pipeline_mode = #tpu.pipeline_mode<synchronous>, transform_indices = @transform_3, window_bounds = array<i64: 8, 128>}]} {
    %c0_i32 = arith.constant 0 : i32
    %0 = arith.cmpi eq, %arg0, %c0_i32 : i32
    %c0_i32_0 = arith.constant 0 : i32
    %1 = arith.cmpi eq, %arg1, %c0_i32_0 : i32
    %2 = arith.andi %0, %1 : i1
    %3 = arith.extui %2 : i1 to i32
    %c0_i32_1 = arith.constant 0 : i32
    %4 = arith.cmpi ne, %3, %c0_i32_1 : i32
    scf.if %4 {
      %cst_29 = arith.constant 0.000000e+00 : f32
      %64 = vector.broadcast %cst_29 : f32 to vector<8x128xf32>
      %c0_30 = arith.constant 0 : index
      %c0_31 = arith.constant 0 : index
      %65 = vector.load %arg7[%c0_30, %c0_31] : memref<8x128xf32, #tpu.memory_space<vmem>>, vector<8x128xf32>
      tpu.vector_store %arg7[%c0_30, %c0_31], %64 {strides = array<i32>} : memref<8x128xf32, #tpu.memory_space<vmem>>, vector<8x128xf32>,
    } else {
    }
    %c0_i32_2 = arith.constant 0 : i32
    %5 = arith.cmpi eq, %arg1, %c0_i32_2 : i32
    %6 = arith.extui %5 : i1 to i32
    %c0_i32_3 = arith.constant 0 : i32
    %7 = arith.cmpi ne, %6, %c0_i32_3 : i32
    scf.if %7 {
      %cst_29 = arith.constant 0.000000e+00 : f32
      %64 = vector.broadcast %cst_29 : f32 to vector<8x128xf32>
      %c0_30 = arith.constant 0 : index
      %c0_31 = arith.constant 0 : index
      %65 = vector.load %arg6[%c0_30, %c0_31] : memref<8x128xf32, #tpu.memory_space<vmem>>, vector<8x128xf32>
      tpu.vector_store %arg6[%c0_30, %c0_31], %64 {strides = array<i32>} : memref<8x128xf32, #tpu.memory_space<vmem>>, vector<8x128xf32>,
    } else {
    }
    %c0 = arith.constant 0 : index
    %c0_4 = arith.constant 0 : index
    %c0_5 = arith.constant 0 : index
    %c0_6 = arith.constant 0 : index
    %8 = vector.load %arg2[%c0, %c0_4, %c0_5, %c0_6] : memref<1x3x8x128xf32, #tpu.memory_space<vmem>>, vector<1x3x8x128xf32>
    %9 = vector.shape_cast %8 : vector<1x3x8x128xf32> to vector<3x8x128xf32>
    %c0_7 = arith.constant 0 : index
    %c0_8 = arith.constant 0 : index
    %c0_9 = arith.constant 0 : index
    %c0_10 = arith.constant 0 : index
    %10 = vector.load %arg3[%c0_7, %c0_8, %c0_9, %c0_10] : memref<1x3x8x128xf32, #tpu.memory_space<vmem>>, vector<1x3x8x128xf32>
    %11 = vector.shape_cast %10 : vector<1x3x8x128xf32> to vector<3x8x128xf32>
    %12 = arith.subf %9, %11 : vector<3x8x128xf32>
    %c0_11 = arith.constant 0 : index
    %c0_12 = arith.constant 0 : index
    %13 = vector.load %arg7[%c0_11, %c0_12] : memref<8x128xf32, #tpu.memory_space<vmem>>, vector<8x128xf32>
    %14 = math.absf %12 : vector<3x8x128xf32>
    %cst = arith.constant dense<0.000000e+00> : vector<8x128xf32>
    %15 = vector.multi_reduction <add>, %14, %cst [0] : vector<3x8x128xf32> to vector<8x128xf32>
    %16 = arith.addf %13, %15 : vector<8x128xf32>
    %c0_13 = arith.constant 0 : index
    %c0_14 = arith.constant 0 : index
    %17 = vector.load %arg7[%c0_13, %c0_14] : memref<8x128xf32, #tpu.memory_space<vmem>>, vector<8x128xf32>
    tpu.vector_store %arg7[%c0_13, %c0_14], %16 {strides = array<i32>} : memref<8x128xf32, #tpu.memory_space<vmem>>, vector<8x128xf32>,
    %18 = vector.extract_strided_slice %12 {offsets = [0, 0, 0], sizes = [1, 8, 128], strides = [1, 1, 1]} : vector<3x8x128xf32> to vector<1x8x128xf32>
    %19 = vector.shape_cast %18 : vector<1x8x128xf32> to vector<8x128xf32>
    %cst_15 = arith.constant 3.6805737 : f32
    %20 = vector.broadcast %cst_15 : f32 to vector<8x128xf32>
    %21 = arith.mulf %20, %19 : vector<8x128xf32>
    %22 = arith.mulf %21, %19 : vector<8x128xf32>
    %cst_16 = arith.constant 0.0251793358 : f32
    %23 = vector.broadcast %cst_16 : f32 to vector<8x128xf32>
    %24 = arith.mulf %23, %19 : vector<8x128xf32>
    %25 = vector.extract_strided_slice %12 {offsets = [1, 0, 0], sizes = [1, 8, 128], strides = [1, 1, 1]} : vector<3x8x128xf32> to vector<1x8x128xf32>
    %26 = vector.shape_cast %25 : vector<1x8x128xf32> to vector<8x128xf32>
    %27 = arith.mulf %24, %26 : vector<8x128xf32>
    %28 = arith.addf %22, %27 : vector<8x128xf32>
    %cst_17 = arith.constant -1.58480752 : f32
    %29 = vector.broadcast %cst_17 : f32 to vector<8x128xf32>
    %30 = arith.mulf %29, %19 : vector<8x128xf32>
    %31 = vector.extract_strided_slice %12 {offsets = [2, 0, 0], sizes = [1, 8, 128], strides = [1, 1, 1]} : vector<3x8x128xf32> to vector<1x8x128xf32>
    %32 = vector.shape_cast %31 : vector<1x8x128xf32> to vector<8x128xf32>
    %33 = arith.mulf %30, %32 : vector<8x128xf32>
    %34 = arith.addf %28, %33 : vector<8x128xf32>
    %35 = vector.extract_strided_slice %12 {offsets = [1, 0, 0], sizes = [1, 8, 128], strides = [1, 1, 1]} : vector<3x8x128xf32> to vector<1x8x128xf32>
    %36 = vector.shape_cast %35 : vector<1x8x128xf32> to vector<8x128xf32>
    %cst_18 = arith.constant 5.69359827 : f32
    %37 = vector.broadcast %cst_18 : f32 to vector<8x128xf32>
    %38 = arith.mulf %37, %36 : vector<8x128xf32>
    %39 = arith.mulf %38, %36 : vector<8x128xf32>
    %40 = arith.addf %34, %39 : vector<8x128xf32>
    %cst_19 = arith.constant 3.08915234 : f32
    %41 = vector.broadcast %cst_19 : f32 to vector<8x128xf32>
    %42 = arith.mulf %41, %36 : vector<8x128xf32>
    %43 = vector.extract_strided_slice %12 {offsets = [2, 0, 0], sizes = [1, 8, 128], strides = [1, 1, 1]} : vector<3x8x128xf32> to vector<1x8x128xf32>
    %44 = vector.shape_cast %43 : vector<1x8x128xf32> to vector<8x128xf32>
    %45 = arith.mulf %42, %44 : vector<8x128xf32>
    %46 = arith.addf %40, %45 : vector<8x128xf32>
    %47 = vector.extract_strided_slice %12 {offsets = [2, 0, 0], sizes = [1, 8, 128], strides = [1, 1, 1]} : vector<3x8x128xf32> to vector<1x8x128xf32>
    %48 = vector.shape_cast %47 : vector<1x8x128xf32> to vector<8x128xf32>
    %cst_20 = arith.constant 3.72258282 : f32
    %49 = vector.broadcast %cst_20 : f32 to vector<8x128xf32>
    %50 = arith.mulf %49, %48 : vector<8x128xf32>
    %51 = arith.mulf %50, %48 : vector<8x128xf32>
    %52 = arith.addf %46, %51 : vector<8x128xf32>
    %c0_21 = arith.constant 0 : index
    %c0_22 = arith.constant 0 : index
    %53 = vector.load %arg6[%c0_21, %c0_22] : memref<8x128xf32, #tpu.memory_space<vmem>>, vector<8x128xf32>
    %54 = arith.addf %53, %52 : vector<8x128xf32>
    %c0_23 = arith.constant 0 : index
    %c0_24 = arith.constant 0 : index
    %55 = vector.load %arg6[%c0_23, %c0_24] : memref<8x128xf32, #tpu.memory_space<vmem>>, vector<8x128xf32>
    tpu.vector_store %arg6[%c0_23, %c0_24], %54 {strides = array<i32>} : memref<8x128xf32, #tpu.memory_space<vmem>>, vector<8x128xf32>,
    %c0_i32_25 = arith.constant 0 : i32
    %56 = arith.cmpi eq, %arg1, %c0_i32_25 : i32
    %57 = arith.extui %56 : i1 to i32
    %c0_i32_26 = arith.constant 0 : i32
    %58 = arith.cmpi ne, %57, %c0_i32_26 : i32
    scf.if %58 {
      %c0_29 = arith.constant 0 : index
      %c0_30 = arith.constant 0 : index
      %64 = vector.load %arg6[%c0_29, %c0_30] : memref<8x128xf32, #tpu.memory_space<vmem>>, vector<8x128xf32>
      %65 = vector.shape_cast %64 : vector<8x128xf32> to vector<1x8x128xf32>
      %cst_31 = arith.constant dense<0.000000e+00> : vector<1xf32>
      %66 = vector.multi_reduction <add>, %65, %cst_31 [1, 2] : vector<1x8x128xf32> to vector<1xf32>
      %67 = vector.shape_cast %66 : vector<1xf32> to vector<1x1x1xf32>
      %68 = vector.extract %67[0, 0, 0] : f32 from vector<1x1x1xf32>
      %69 = vector.broadcast %68 : f32 to vector<1x8x128xf32>
      %c0_32 = arith.constant 0 : index
      %c0_33 = arith.constant 0 : index
      %c0_34 = arith.constant 0 : index
      %70 = vector.load %arg4[%c0_32, %c0_33, %c0_34] : memref<1x8x128xf32, #tpu.memory_space<vmem>>, vector<1x8x128xf32>
      tpu.vector_store %arg4[%c0_32, %c0_33, %c0_34], %69 {strides = array<i32>} : memref<1x8x128xf32, #tpu.memory_space<vmem>>, vector<1x8x128xf32>,
    } else {
    }
    %c1_i32 = arith.constant 1 : i32
    %59 = arith.cmpi eq, %arg0, %c1_i32 : i32
    %c0_i32_27 = arith.constant 0 : i32
    %60 = arith.cmpi eq, %arg1, %c0_i32_27 : i32
    %61 = arith.andi %59, %60 : i1
    %62 = arith.extui %61 : i1 to i32
    %c0_i32_28 = arith.constant 0 : i32
    %63 = arith.cmpi ne, %62, %c0_i32_28 : i32
    scf.if %63 {
      %c0_29 = arith.constant 0 : index
      %c0_30 = arith.constant 0 : index
      %64 = vector.load %arg7[%c0_29, %c0_30] : memref<8x128xf32, #tpu.memory_space<vmem>>, vector<8x128xf32>
      %65 = vector.shape_cast %64 : vector<8x128xf32> to vector<1x8x128xf32>
      %cst_31 = arith.constant dense<0.000000e+00> : vector<1xf32>
      %66 = vector.multi_reduction <add>, %65, %cst_31 [1, 2] : vector<1x8x128xf32> to vector<1xf32>
      %67 = vector.shape_cast %66 : vector<1xf32> to vector<1x1x1xf32>
      %68 = vector.extract %67[0, 0, 0] : f32 from vector<1x1x1xf32>
      %69 = vector.broadcast %68 : f32 to vector<8x128xf32>
      %c0_32 = arith.constant 0 : index
      %c0_33 = arith.constant 0 : index
      %70 = vector.load %arg5[%c0_32, %c0_33] : memref<8x128xf32, #tpu.memory_space<vmem>>, vector<8x128xf32>
      tpu.vector_store %arg5[%c0_32, %c0_33], %69 {strides = array<i32>} : memref<8x128xf32, #tpu.memory_space<vmem>>, vector<8x128xf32>,
    } else {
    }
    return
  }
  func.func @transform_0(%arg0: i32, %arg1: i32) -> (i32, i32, i32, i32) {
    %c0_i32 = arith.constant 0 : i32
    %c0_i32_0 = arith.constant 0 : i32
    %c0_i32_1 = arith.constant 0 : i32
    return %arg0, %c0_i32, %arg1, %c0_i32_0 : i32, i32, i32, i32
  }
  func.func @transform_1(%arg0: i32, %arg1: i32) -> (i32, i32, i32, i32) {
    %c0_i32 = arith.constant 0 : i32
    %c0_i32_0 = arith.constant 0 : i32
    %c0_i32_1 = arith.constant 0 : i32
    return %arg0, %c0_i32, %arg1, %c0_i32_0 : i32, i32, i32, i32
  }
  func.func @transform_2(%arg0: i32, %arg1: i32) -> (i32, i32, i32) {
    %c0_i32 = arith.constant 0 : i32
    %c0_i32_0 = arith.constant 0 : i32
    %c0_i32_1 = arith.constant 0 : i32
    return %arg0, %c0_i32, %c0_i32_0 : i32, i32, i32
  }
  func.func @transform_3(%arg0: i32, %arg1: i32) -> (i32, i32) {
    %c0_i32 = arith.constant 0 : i32
    %c0_i32_0 = arith.constant 0 : i32
    %c0_i32_1 = arith.constant 0 : i32
    return %c0_i32, %c0_i32_0 : i32, i32
  }
}

module attributes {stable_mosaic.version = 11 : i64} {
  func.func @_fvd_kernel(%arg0: i32, %arg1: memref<2x3072xf32, #tpu.memory_space<vmem>>, %arg2: memref<2x3072xf32, #tpu.memory_space<vmem>>, %arg3: memref<3072x128xbf16, #tpu.memory_space<vmem>>, %arg4: memref<8x128xf32, #tpu.memory_space<vmem>>, %arg5: memref<8x128xf32, #tpu.memory_space<vmem>>, %arg6: memref<2x128xf32, #tpu.memory_space<vmem>>, %arg7: memref<2x128xf32, #tpu.memory_space<vmem>>) attributes {dimension_semantics = [#tpu.dimension_semantics<arbitrary>], iteration_bounds = array<i64: 1>, scalar_prefetch = 0 : i64, scratch_operands = 2 : i64, tpu.core_type = #tpu.core_type<tc>, window_params = [{transform_indices = @transform_0, window_bounds = array<i64: 2, 3072>}, {transform_indices = @transform_1, window_bounds = array<i64: 2, 3072>}, {transform_indices = @transform_2, window_bounds = array<i64: 3072, 128>}, {pipeline_mode = #tpu.pipeline_mode<synchronous>, transform_indices = @transform_3, window_bounds = array<i64: 8, 128>}, {pipeline_mode = #tpu.pipeline_mode<synchronous>, transform_indices = @transform_4, window_bounds = array<i64: 8, 128>}]} {
    %c0_i32 = arith.constant 0 : i32
    %0 = arith.cmpi eq, %arg0, %c0_i32 : i32
    %1 = arith.extui %0 : i1 to i32
    %c0_i32_0 = arith.constant 0 : i32
    %2 = arith.cmpi ne, %1, %c0_i32_0 : i32
    scf.if %2 {
      %cst_21 = arith.constant 0.000000e+00 : f32
      %27 = vector.broadcast %cst_21 : f32 to vector<2x128xf32>
      %c0_22 = arith.constant 0 : index
      %c0_23 = arith.constant 0 : index
      %28 = vector.load %arg6[%c0_22, %c0_23] : memref<2x128xf32, #tpu.memory_space<vmem>>, vector<2x128xf32>
      tpu.vector_store %arg6[%c0_22, %c0_23], %27 {strides = array<i32>} : memref<2x128xf32, #tpu.memory_space<vmem>>, vector<2x128xf32>,
      %cst_24 = arith.constant 0.000000e+00 : f32
      %29 = vector.broadcast %cst_24 : f32 to vector<2x128xf32>
      %c0_25 = arith.constant 0 : index
      %c0_26 = arith.constant 0 : index
      %30 = vector.load %arg7[%c0_25, %c0_26] : memref<2x128xf32, #tpu.memory_space<vmem>>, vector<2x128xf32>
      tpu.vector_store %arg7[%c0_25, %c0_26], %29 {strides = array<i32>} : memref<2x128xf32, #tpu.memory_space<vmem>>, vector<2x128xf32>,
    } else {
    }
    %c0 = arith.constant 0 : index
    %c0_1 = arith.constant 0 : index
    %3 = vector.load %arg1[%c0, %c0_1] : memref<2x3072xf32, #tpu.memory_space<vmem>>, vector<2x3072xf32>
    %cst = arith.constant 1.000000e+00 : f32
    %4 = vector.broadcast %cst : f32 to vector<2x3072xf32>
    %5 = arith.addf %3, %4 : vector<2x3072xf32>
    %cst_2 = arith.constant 5.000000e-01 : f32
    %6 = vector.broadcast %cst_2 : f32 to vector<2x3072xf32>
    %7 = arith.mulf %5, %6 : vector<2x3072xf32>
    %8 = arith.truncf %7 : vector<2x3072xf32> to vector<2x3072xbf16>
    %c0_3 = arith.constant 0 : index
    %c0_4 = arith.constant 0 : index
    %9 = vector.load %arg2[%c0_3, %c0_4] : memref<2x3072xf32, #tpu.memory_space<vmem>>, vector<2x3072xf32>
    %cst_5 = arith.constant 1.000000e+00 : f32
    %10 = vector.broadcast %cst_5 : f32 to vector<2x3072xf32>
    %11 = arith.addf %9, %10 : vector<2x3072xf32>
    %cst_6 = arith.constant 5.000000e-01 : f32
    %12 = vector.broadcast %cst_6 : f32 to vector<2x3072xf32>
    %13 = arith.mulf %11, %12 : vector<2x3072xf32>
    %14 = arith.truncf %13 : vector<2x3072xf32> to vector<2x3072xbf16>
    %c0_7 = arith.constant 0 : index
    %c0_8 = arith.constant 0 : index
    %15 = vector.load %arg3[%c0_7, %c0_8] : memref<3072x128xbf16, #tpu.memory_space<vmem>>, vector<3072x128xbf16>
    %c0_9 = arith.constant 0 : index
    %c0_10 = arith.constant 0 : index
    %16 = vector.load %arg6[%c0_9, %c0_10] : memref<2x128xf32, #tpu.memory_space<vmem>>, vector<2x128xf32>
    %cst_11 = arith.constant dense<0.000000e+00> : vector<2x128xf32>
    %17 = tpu.matmul %8, %15, %cst_11 {dimension_numbers = #tpu.dot_dimension_numbers<[1], [0], [0], [1], [0, 0, 1, 1], [], []>} : vector<2x3072xbf16>, vector<3072x128xbf16>, vector<2x128xf32> -> vector<2x128xf32>
    %18 = arith.addf %16, %17 : vector<2x128xf32>
    %c0_12 = arith.constant 0 : index
    %c0_13 = arith.constant 0 : index
    %19 = vector.load %arg6[%c0_12, %c0_13] : memref<2x128xf32, #tpu.memory_space<vmem>>, vector<2x128xf32>
    tpu.vector_store %arg6[%c0_12, %c0_13], %18 {strides = array<i32>} : memref<2x128xf32, #tpu.memory_space<vmem>>, vector<2x128xf32>,
    %c0_14 = arith.constant 0 : index
    %c0_15 = arith.constant 0 : index
    %20 = vector.load %arg7[%c0_14, %c0_15] : memref<2x128xf32, #tpu.memory_space<vmem>>, vector<2x128xf32>
    %cst_16 = arith.constant dense<0.000000e+00> : vector<2x128xf32>
    %21 = tpu.matmul %14, %15, %cst_16 {dimension_numbers = #tpu.dot_dimension_numbers<[1], [0], [0], [1], [0, 0, 1, 1], [], []>} : vector<2x3072xbf16>, vector<3072x128xbf16>, vector<2x128xf32> -> vector<2x128xf32>
    %22 = arith.addf %20, %21 : vector<2x128xf32>
    %c0_17 = arith.constant 0 : index
    %c0_18 = arith.constant 0 : index
    %23 = vector.load %arg7[%c0_17, %c0_18] : memref<2x128xf32, #tpu.memory_space<vmem>>, vector<2x128xf32>
    tpu.vector_store %arg7[%c0_17, %c0_18], %22 {strides = array<i32>} : memref<2x128xf32, #tpu.memory_space<vmem>>, vector<2x128xf32>,
    %c0_i32_19 = arith.constant 0 : i32
    %24 = arith.cmpi eq, %arg0, %c0_i32_19 : i32
    %25 = arith.extui %24 : i1 to i32
    %c0_i32_20 = arith.constant 0 : i32
    %26 = arith.cmpi ne, %25, %c0_i32_20 : i32
    scf.if %26 {
      %c0_21 = arith.constant 0 : index
      %c0_22 = arith.constant 0 : index
      %27 = vector.load %arg6[%c0_21, %c0_22] : memref<2x128xf32, #tpu.memory_space<vmem>>, vector<2x128xf32>
      %c0_23 = arith.constant 0 : index
      %c0_24 = arith.constant 0 : index
      %28 = vector.load %arg7[%c0_23, %c0_24] : memref<2x128xf32, #tpu.memory_space<vmem>>, vector<2x128xf32>
      %cst_25 = arith.constant dense<0.000000e+00> : vector<128xf32>
      %29 = vector.multi_reduction <add>, %27, %cst_25 [0] : vector<2x128xf32> to vector<128xf32>
      %30 = vector.shape_cast %29 : vector<128xf32> to vector<1x128xf32>
      %cst_26 = arith.constant 2.000000e+00 : f32
      %31 = vector.broadcast %cst_26 : f32 to vector<1x128xf32>
      %32 = arith.divf %30, %31 : vector<1x128xf32>
      %cst_27 = arith.constant dense<0.000000e+00> : vector<128xf32>
      %33 = vector.multi_reduction <add>, %28, %cst_27 [0] : vector<2x128xf32> to vector<128xf32>
      %34 = vector.shape_cast %33 : vector<128xf32> to vector<1x128xf32>
      %cst_28 = arith.constant 2.000000e+00 : f32
      %35 = vector.broadcast %cst_28 : f32 to vector<1x128xf32>
      %36 = arith.divf %34, %35 : vector<1x128xf32>
      %37 = arith.subf %32, %36 : vector<1x128xf32>
      %38 = arith.mulf %37, %37 : vector<1x128xf32>
      %39 = vector.shape_cast %38 : vector<1x128xf32> to vector<1x1x128xf32>
      %cst_29 = arith.constant dense<0.000000e+00> : vector<1xf32>
      %40 = vector.multi_reduction <add>, %39, %cst_29 [1, 2] : vector<1x1x128xf32> to vector<1xf32>
      %41 = vector.shape_cast %40 : vector<1xf32> to vector<1x1x1xf32>
      %42 = vector.extract %41[0, 0, 0] : f32 from vector<1x1x1xf32>
      %cst_30 = arith.constant 1.280000e+02 : f32
      %43 = arith.divf %42, %cst_30 : f32
      %44 = vector.broadcast %32 : vector<1x128xf32> to vector<2x128xf32>
      %45 = arith.subf %27, %44 : vector<2x128xf32>
      %46 = vector.broadcast %36 : vector<1x128xf32> to vector<2x128xf32>
      %47 = arith.subf %28, %46 : vector<2x128xf32>
      %cst_31 = arith.constant dense<0.000000e+00> : vector<128x128xf32>
      %48 = tpu.matmul %45, %45, %cst_31 {dimension_numbers = #tpu.dot_dimension_numbers<[0], [0], [1], [1], [0, 1, 1, 1], [], []>} : vector<2x128xf32>, vector<2x128xf32>, vector<128x128xf32> -> vector<128x128xf32>
      %cst_32 = arith.constant 1.000000e+00 : f32
      %49 = vector.broadcast %cst_32 : f32 to vector<128x128xf32>
      %50 = arith.divf %48, %49 : vector<128x128xf32>
      %cst_33 = arith.constant dense<0.000000e+00> : vector<128x128xf32>
      %51 = tpu.matmul %47, %47, %cst_33 {dimension_numbers = #tpu.dot_dimension_numbers<[0], [0], [1], [1], [0, 1, 1, 1], [], []>} : vector<2x128xf32>, vector<2x128xf32>, vector<128x128xf32> -> vector<128x128xf32>
      %cst_34 = arith.constant 1.000000e+00 : f32
      %52 = vector.broadcast %cst_34 : f32 to vector<128x128xf32>
      %53 = arith.divf %51, %52 : vector<128x128xf32>
      %54 = arith.subf %50, %53 : vector<128x128xf32>
      %55 = arith.mulf %54, %54 : vector<128x128xf32>
      %56 = vector.shape_cast %55 : vector<128x128xf32> to vector<1x128x128xf32>
      %cst_35 = arith.constant dense<0.000000e+00> : vector<1xf32>
      %57 = vector.multi_reduction <add>, %56, %cst_35 [1, 2] : vector<1x128x128xf32> to vector<1xf32>
      %58 = vector.shape_cast %57 : vector<1xf32> to vector<1x1x1xf32>
      %59 = vector.extract %58[0, 0, 0] : f32 from vector<1x1x1xf32>
      %cst_36 = arith.constant 1.638400e+04 : f32
      %60 = arith.divf %59, %cst_36 : f32
      %61 = vector.broadcast %43 : f32 to vector<8x128xf32>
      %c0_37 = arith.constant 0 : index
      %c0_38 = arith.constant 0 : index
      %62 = vector.load %arg4[%c0_37, %c0_38] : memref<8x128xf32, #tpu.memory_space<vmem>>, vector<8x128xf32>
      tpu.vector_store %arg4[%c0_37, %c0_38], %61 {strides = array<i32>} : memref<8x128xf32, #tpu.memory_space<vmem>>, vector<8x128xf32>,
      %63 = vector.broadcast %60 : f32 to vector<8x128xf32>
      %c0_39 = arith.constant 0 : index
      %c0_40 = arith.constant 0 : index
      %64 = vector.load %arg5[%c0_39, %c0_40] : memref<8x128xf32, #tpu.memory_space<vmem>>, vector<8x128xf32>
      tpu.vector_store %arg5[%c0_39, %c0_40], %63 {strides = array<i32>} : memref<8x128xf32, #tpu.memory_space<vmem>>, vector<8x128xf32>,
    } else {
    }
    return
  }
  func.func @transform_0(%arg0: i32) -> (i32, i32) {
    %c0_i32 = arith.constant 0 : i32
    %c0_i32_0 = arith.constant 0 : i32
    return %c0_i32, %arg0 : i32, i32
  }
  func.func @transform_1(%arg0: i32) -> (i32, i32) {
    %c0_i32 = arith.constant 0 : i32
    %c0_i32_0 = arith.constant 0 : i32
    return %c0_i32, %arg0 : i32, i32
  }
  func.func @transform_2(%arg0: i32) -> (i32, i32) {
    %c0_i32 = arith.constant 0 : i32
    %c0_i32_0 = arith.constant 0 : i32
    return %arg0, %c0_i32 : i32, i32
  }
  func.func @transform_3(%arg0: i32) -> (i32, i32) {
    %c0_i32 = arith.constant 0 : i32
    %c0_i32_0 = arith.constant 0 : i32
    %c0_i32_1 = arith.constant 0 : i32
    return %c0_i32, %c0_i32_0 : i32, i32
  }
  func.func @transform_4(%arg0: i32) -> (i32, i32) {
    %c0_i32 = arith.constant 0 : i32
    %c0_i32_0 = arith.constant 0 : i32
    %c0_i32_1 = arith.constant 0 : i32
    return %c0_i32, %c0_i32_0 : i32, i32
  }
}

</mosaic_0001>

<bundles_post_ra>
// kernel: _forward_impl.2
= control target key start
LH: loop header
LB: loop body
LE: loop exit
PB: predicated region body
PF: predicated region fallthrough
CT: control target
= control target key end

     0   :  { %s481_s12 = smov 0   ;;  %s483_s13 = smov 0   ;;  %s529_s0 = inlined_call_operand.vmem [shape: f32[2,3,8,128], index: 0, kind: input, shape index: {}]   ;;  %s530_s1 = inlined_call_operand.vmem [shape: f32[2,3,8,128], index: 1, kind: input, shape index: {}]   ;;  %s531_s2 = inlined_call_operand.vmem [shape: f32[2,8,128], index: 2, kind: output, shape index: {0}]   ;;  %s532_s3 = inlined_call_operand.vmem [shape: f32[8,128], index: 3, kind: output, shape index: {1}]  }
   0x1   :  { %s485_s14 = smov 0  }
   0x2 LB: > { %s26_s15 = sadd.s32 1, %s454_s13  ;;  %p396_p0 = scmp.ge.s32.totalorder %s458_s14, 1  ;;  %s458_s14 = sphi %s485_s14, %s14_s14   ;;  %s454_s13 = sphi %s483_s13, %s534_s13   ;;  %s450_s12 = sphi %s481_s12, %s533_s12  }
   0x3   : > { %p28_p1 = scmp.ge.s32.totalorder %s26_s15, 2  ;;  %p167_p2 = scmp.lt.s32.totalorder %s458_s14, 3 }
   0x5   : > { %s536_s15 = smov (%p28_p1, %s26_s15), 0  ;;  %p168_p3 = pnand %p396_p0, %p167_p2 }
   0x6   : > { %p201_p4 = scmp.lt.s32.totalorder (!%p168_p3), %s450_s12, 1  ;;  %p221_p5 = scmp.eq.s32.totalorder (!%p168_p3), %s450_s12, 0 }
   0x7   : > { %171 = sbr.rel (%p168_p3) target bundleno = 225 (0xe1), region = 28 }
   0xc   : > { %s202_s16 = scalar_select %p201_p4, %s450_s12, 1  ;;  %v460_v0 = vmov (%p221_p5), 0.0  }
   0xd   : > { %226 = sbr.rel (!%p221_p5) target bundleno = 18 (0x12), region = 32  ;;  %227 = vst [vmem:[#allocation3] sm:$0xff] (%p221_p5), %v460_v0 }
   0xe   : > { %s406_s17 = smul.u32 24, %s202_s16  ;;  %s399_s18 = sshll.u32 %s202_s16, 3 }
   0xf   : > { %s507_s21 = scalar_lea.vmem %s531_s2, %s399_s18 }
  0x10   : > { %s208_s24 = scalar_lea.vmem %s529_s0, %s406_s17  ;;  %s216_s27 = scalar_lea.vmem %s530_s1, %s406_s17 }
  0x12 PF: > { %v232_v1 = vld [vmem:[%s208_s24] sm:$0xff]  ;;  %v233_v2 = vld [vmem:[%s208_s24 + $0x8] sm:$0xff]  ;;  %v234_v3 = vld [vmem:[%s208_s24 + $0x10] sm:$0xff]  ;;  %p284_p6 = scmp.eq.s32.totalorder %s450_s12, 1 }
  0x13   : > { %v235_v4 = vld [vmem:[%s216_s27] sm:$0xff]  ;;  %v236_v5 = vld [vmem:[%s216_s27 + $0x8] sm:$0xff]  ;;  %v237_v6 = vld [vmem:[%s216_s27 + $0x10] sm:$0xff] }
  0x14   : > { %v238_v7 = vsub.f32 %v232_v1, %v235_v4  ;;  %v239_v8 = vsub.f32 %v233_v2, %v236_v5  ;;  %v240_v9 = vsub.f32 %v234_v3, %v237_v6  ;;  %v241_v18 = vld [vmem:[#allocation3] sm:$0xff] }
  0x16   : > { %v242_v10 = vand.u32 2147483647, %v238_v7  ;;  %v243_v11 = vand.u32 2147483647, %v239_v8  ;;  %v244_v12 = vand.u32 2147483647, %v240_v9 }
  0x17   : > { %v249_v13 = vmul.f32 3.6805737, %v238_v7  ;;  %v251_v14 = vmul.f32 0.025179336, %v238_v7  ;;  %v254_v15 = vmul.f32 -1.5848075, %v238_v7 }
  0x18   : > { %v245_v16 = vadd.f32 %v243_v11, %v242_v10  ;;  %v257_v17 = vmul.f32 5.6935983, %v239_v8  ;;  %v260_v22 = vmul.f32 3.0891523, %v239_v8  ;;  %v263_v26 = vmul.f32 3.7225828, %v240_v9 }
  0x19   : > { %v250_v19 = vmul.f32 %v249_v13, %v238_v7  ;;  %v252_v20 = vmul.f32 %v251_v14, %v239_v8  ;;  %v255_v21 = vmul.f32 %v254_v15, %v240_v9 }
  0x1a   : > { %v246_v23 = vadd.f32 %v245_v16, %v244_v12  ;;  %v258_v25 = vmul.f32 %v257_v17, %v239_v8  ;;  %v261_v29 = vmul.f32 %v260_v22, %v240_v9  ;;  %v264_v31 = vmul.f32 %v263_v26, %v240_v9 }
  0x1b   : > { %v253_v24 = vadd.f32 %v252_v20, %v250_v19 }
  0x1c   : > { %v247_v27 = vadd.f32 %v246_v23, %v241_v18 }
  0x1d   : > { %v256_v28 = vadd.f32 %v255_v21, %v253_v24 }
  0x1e   : > { %248 = vst [vmem:[#allocation3] sm:$0xff] %v247_v27 }
  0x1f   : > { %v259_v30 = vadd.f32 %v258_v25, %v256_v28 }
  0x21   : > { %v262_v32 = vadd.f32 %v261_v29, %v259_v30 }
  0x23   : > { %v265_v33 = vadd.f32 %v264_v31, %v262_v32 }
  0x25   : > { %273 = vadd.xlane.f32.xlu0 %v265_v33  ;;  %v289_v42 = vld [vmem:[#allocation3] sm:$0xff] (%p284_p6) }
  0x2d   : > { %290 = vadd.xlane.f32.xlu0 (%p284_p6), %v289_v42 }
  0x98   : > { %v274_v34 = vpop.xlane.xlu0 %273 }
  0x99   : > { %v275_v35 = vrot.slane %v274_v34, 4 }
  0x9b   : > { %v276_v36 = vadd.f32 %v275_v35, %v274_v34 }
  0x9d   : > { %v277_v37 = vrot.slane %v276_v36, 2 }
  0x9f   : > { %v278_v38 = vadd.f32 %v277_v37, %v276_v36 }
  0xa0   : > { %v291_v43 = vpop.xlane.xlu0 (%p284_p6), %290 }
  0xa1   : > { %v279_v39 = vrot.slane %v278_v38, 1  ;;  %v292_v44 = vrot.slane (%p284_p6), %v291_v43, 4 }
  0xa3   : > { %v280_v40 = vadd.f32 %v279_v39, %v278_v38  ;;  %v293_v45 = vadd.f32 (%p284_p6), %v292_v44, %v291_v43 }
  0xa5   : > { %407 = vpush %v280_v40  ;;  %v294_v46 = vrot.slane (%p284_p6), %v293_v45, 2 }
  0xa7   : > { %v295_v47 = vadd.f32 (%p284_p6), %v294_v46, %v293_v45 }
  0xa9   : > { %v296_v48 = vrot.slane (%p284_p6), %v295_v47, 1 }
  0xab   : > { %v297_v49 = vadd.f32 (%p284_p6), %v296_v48, %v295_v47 }
  0xad   : > { %409 = vpush (%p284_p6), %v297_v49 }
  0xd4   : > { %288 = sbr.rel (!%p284_p6) target bundleno = 225 (0xe1), region = 44 }
  0xd6   : > { %s408_s28 = spop %407 }
  0xd7   : > { %v282_v41 = vstv %s408_s28 }
  0xd8   : > { %283 = vst [vmem:[%s507_s21] sm:$0xff] %v282_v41 }
  0xde   : > { %s410_s29 = spop %409 }
  0xdf   : > { %v299_v50 = vstv %s410_s29 }
  0xe0   : > { %300 = vst [vmem:[%s532_s3] sm:$0xff] %v299_v50 }
  0xe1 PF: > { %s14_s14 = sadd.s32 1, %s458_s14   ;;  %s533_s12 = smov %s454_s13 }
  0xe2   : > { %p11_p7 = scmp.ge.s32.totalorder %s14_s14, 4   ;;  %s534_s13 = smov %s536_s15 }
  0xe4   :  { %13 = sbr.rel (!%p11_p7) target bundleno = 2 (0x2), region = 85 }

// kernel: _forward_impl.3
= control target key start
LH: loop header
LB: loop body
LE: loop exit
PB: predicated region body
PF: predicated region fallthrough
CT: control target
= control target key end

     0   :  { %10 = vsyncpa [#allocation5], 0  ;;  %s3881_s18 = smov [#allocation4]   ;;  %s3882_s20 = smov 64   ;;  %s4820_s0 = inlined_call_operand.vmem [shape: f32[2,3072], index: 0, kind: input, shape index: {}]   ;;  %s4821_s1 = inlined_call_operand.vmem [shape: f32[2,3072], index: 1, kind: input, shape index: {}]   ;;  %s4822_s2 = inlined_call_operand.hbm [shape: bf16[3072,128], index: 2, kind: input, shape index: {}]   ;;  %s4823_s3 = inlined_call_operand.vmem [shape: f32[8,128], index: 3, kind: output, shape index: {0}]   ;;  %s4824_s4 = inlined_call_operand.vmem [shape: f32[8,128], index: 4, kind: output, shape index: {1}]  }
   0x1   :  { %s19_s17 = sshll.u32 %s4822_s2, 4  ;;  %s21_s19 = sshll.u32 %s3881_s18, 4  ;;  %s20_s17 = int_to_ptr.hbm [resolvable:$true] %s19_s17  ;;  %s22_s19 = int_to_ptr.vmem [resolvable:$true] %s21_s19 }
   0x2   :  { %s3883_s21 = smov 4  }
   0x3   :  { %27 = dma.hbm_to_vmem [thread:$0]  %s20_s17, 24576, %s22_s19, [#allocation5], %s3882_s20, %s3882_s20, %s3883_s21  }
   0x4   :  { %3879 = dma.done.wait [#allocation5], 24576  }
   0x5   :  { %3880 = vsyncadd [#allocation5], 4294942720  ;;  %v3916_v0 = vld [vmem:[#allocation4 + $0x38] sm:$0xff]  ;;  %v3926_v4 = vld [vmem:[#allocation4 + $0x30] sm:$0xff]  ;;  %vm2415_vm0 = vcmask 1041408   ;;  %vm2495_vm2 = vcmask 15360  }
   0x6   :  { %v3918_v1 = vld [vmem:[#allocation4 + $0x78] sm:$0xff]  ;;  %1781 = vmatpush.bf16.msra.mxu0 %v3916_v0  ;;  %v3928_v5 = vld [vmem:[#allocation4 + $0x70] sm:$0xff]  ;;  %v3938_v8 = vld [vmem:[#allocation4 + $0x28] sm:$0xff]  ;;  %vm2441_vm3 = vcmask 1040384  }
   0x7   :  { %v3920_v2 = vld [vmem:[#allocation4 + $0xb8] sm:$0xff]  ;;  %1794 = vmatpush.bf16.msra.mxu1 %v3918_v1  ;;  %v3932_v6 = vld [vmem:[#allocation4 + $0xb0] sm:$0xff]  ;;  %v3940_v9 = vld [vmem:[#allocation4 + $0x68] sm:$0xff] }
   0x8   :  { %v3922_v3 = vld [vmem:[#allocation4 + $0xf8] sm:$0xff]  ;;  %1807 = vmatpush.bf16.msra.mxu2 %v3920_v2  ;;  %v3934_v7 = vld [vmem:[#allocation4 + $0xf0] sm:$0xff]  ;;  %v3944_v10 = vld [vmem:[#allocation4 + $0xa8] sm:$0xff] }
   0x9   :  { %1820 = vmatpush.bf16.msra.mxu3 %v3922_v3  ;;  %v3946_v11 = vld [vmem:[#allocation4 + $0xe8] sm:$0xff]  ;;  %v3950_v12 = vld [vmem:[#allocation4 + $0x20] sm:$0xff]  ;;  %v3962_v16 = vld [vmem:[#allocation4 + $0x18] sm:$0xff] }
   0xa   :  { %1782 = vmatpush.bf16.msra.mxu0 %v3926_v4  ;;  %v3952_v13 = vld [vmem:[#allocation4 + $0x60] sm:$0xff]  ;;  %v3964_v17 = vld [vmem:[#allocation4 + $0x58] sm:$0xff]  ;;  %v3977_v21 = vld [vmem:[#allocation4 + $0x10] sm:$0xff] }
   0xb   :  { %1795 = vmatpush.bf16.msra.mxu1 %v3928_v5  ;;  %v3956_v14 = vld [vmem:[#allocation4 + $0xa0] sm:$0xff]  ;;  %v3968_v18 = vld [vmem:[#allocation4 + $0x98] sm:$0xff]  ;;  %v3979_v22 = vld [vmem:[#allocation4 + $0x50] sm:$0xff] }
   0xc   :  { %1808 = vmatpush.bf16.msra.mxu2 %v3932_v6  ;;  %v3958_v15 = vld [vmem:[#allocation4 + $0xe0] sm:$0xff]  ;;  %v3970_v19 = vld [vmem:[#allocation4 + $0xd8] sm:$0xff]  ;;  %v3983_v24 = vld [vmem:[#allocation4 + $0x90] sm:$0xff] }
   0xd   :  { %1821 = vmatpush.bf16.msra.mxu3 %v3934_v7  ;;  %v38_v20 = vld [vmem:[%s4820_s0] sm:$0xff]  ;;  %v40_v27 = vld [vmem:[%s4820_s0 + $0x10] sm:$0xff]  ;;  %v39_v30 = vld [vmem:[%s4820_s0 + $0x8] sm:$0xff] }
   0xe   :  { %1783 = vmatpush.bf16.msra.mxu0 %v3938_v8  ;;  %v44_v23 = vadd.f32 1.0, %v38_v20  ;;  %v3985_v25 = vld [vmem:[#allocation4 + $0xd0] sm:$0xff]  ;;  %v3992_v28 = vld [vmem:[#allocation4 + $0x8] sm:$0xff]  ;;  %v46_v33 = vadd.f32 1.0, %v40_v27  ;;  %v45_v34 = vadd.f32 1.0, %v39_v30  ;;  %v4007_v36 = vld [vmem:[#allocation4] sm:$0xff] }
   0xf   :  { %1796 = vmatpush.bf16.msra.mxu1 %v3940_v9  ;;  %v3994_v29 = vld [vmem:[#allocation4 + $0x48] sm:$0xff]  ;;  %v4009_v37 = vld [vmem:[#allocation4 + $0x40] sm:$0xff]  ;;  %v4017_v40 = vld [vmem:[#allocation4 + $0x138] sm:$0xff] }
  0x10   :  { %1809 = vmatpush.bf16.msra.mxu2 %v3944_v10  ;;  %v50_v26 = vmul.f32 0.5, %v44_v23  ;;  %v4001_v31 = vld [vmem:[#allocation4 + $0x88] sm:$0xff]  ;;  %v51_v35 = vmul.f32 0.5, %v45_v34  ;;  %v4013_v38 = vld [vmem:[#allocation4 + $0x80] sm:$0xff]  ;;  %v52_v41 = vmul.f32 0.5, %v46_v33  ;;  %v4019_v42 = vld [vmem:[#allocation4 + $0x178] sm:$0xff] }
  0x11   :  { %1822 = vmatpush.bf16.msra.mxu3 %v3946_v11  ;;  %v4003_v32 = vld [vmem:[#allocation4 + $0xc8] sm:$0xff]  ;;  %v4015_v39 = vld [vmem:[#allocation4 + $0xc0] sm:$0xff]  ;;  %v4021_v43 = vld [vmem:[#allocation4 + $0x1b8] sm:$0xff] }
  0x12   :  { %1784 = vmatpush.bf16.msra.mxu0 %v3950_v12  ;;  %62 = vst [vmem:[#allocation1] ss:$4 sm:$0xff] %v50_v26  ;;  %v4023_v44 = vld [vmem:[#allocation4 + $0x1f8] sm:$0xff]  ;;  %v4031_v53 = vld [vmem:[#allocation4 + $0x130] sm:$0xff]  ;;  %v4043_v57 = vld [vmem:[#allocation4 + $0x128] sm:$0xff] }
  0x13   :  { %1797 = vmatpush.bf16.msra.mxu1 %v3952_v13  ;;  %64 = vst [vmem:[#allocation1 + $0x20] ss:$4 sm:$0xff] %v51_v35  ;;  %v4033_v54 = vld [vmem:[#allocation4 + $0x170] sm:$0xff]  ;;  %v4045_v58 = vld [vmem:[#allocation4 + $0x168] sm:$0xff]  ;;  %v4058_v62 = vld [vmem:[#allocation4 + $0x120] sm:$0xff] }
  0x14   :  { %1810 = vmatpush.bf16.msra.mxu2 %v3956_v14  ;;  %v4037_v55 = vld [vmem:[#allocation4 + $0x1b0] sm:$0xff]  ;;  %v4049_v59 = vld [vmem:[#allocation4 + $0x1a8] sm:$0xff]  ;;  %v4060_v63 = vld [vmem:[#allocation4 + $0x160] sm:$0xff] }
  0x15   :  { %1823 = vmatpush.bf16.msra.mxu3 %v3958_v15  ;;  %v4039_v56 = vld [vmem:[#allocation4 + $0x1f0] sm:$0xff]  ;;  %v4051_v60 = vld [vmem:[#allocation4 + $0x1e8] sm:$0xff]  ;;  %v4064_v23 = vld [vmem:[#allocation4 + $0x1a0] sm:$0xff] }
  0x16   :  { %1785 = vmatpush.bf16.msra.mxu0 %v3962_v16  ;;  %v41_v61 = vld [vmem:[%s4820_s0 + $0x18] sm:$0xff]  ;;  %4965 = vst [vmem:[#allocation7_spill] sm:$0xff] %v4064_v23  ;;  %v4066_v26 = vld [vmem:[#allocation4 + $0x1e0] sm:$0xff] }
  0x17   :  { %1798 = vmatpush.bf16.msra.mxu1 %v3964_v17  ;;  %v47_v20 = vadd.f32 1.0, %v41_v61  ;;  %4966 = vst [vmem:[#allocation8_spill] sm:$0xff] %v4066_v26  ;;  %v4096_v61 = vld [vmem:[#allocation4 + $0x148] sm:$0xff] }
  0x18   :  { %1811 = vmatpush.bf16.msra.mxu2 %v3968_v18  ;;  %4976 = vst [vmem:[#allocation18_spill] sm:$0xff] %v4096_v61 }
  0x19   :  { %1824 = vmatpush.bf16.msra.mxu3 %v3970_v19  ;;  %v67_v45 = vld.sshfl [vmem:[#allocation1 + $0x10] sm:$0xff pattern:$0x73625140]  ;;  %v65_v46 = vld.sshfl [vmem:[#allocation1] sm:$0xff pattern:$0x73625140] }
  0x1a   :  { %1786 = vmatpush.bf16.msra.mxu0 %v3977_v21  ;;  %v119_v47 = vpack.c.bf16 %v67_v45, %v67_v45  ;;  %v117_v48 = vpack.c.bf16 %v65_v46, %v65_v46  ;;  %v68_v49 = vld.sshfl [vmem:[#allocation1 + $0x18] sm:$0xff pattern:$0x73625140]  ;;  %v66_v50 = vld.sshfl [vmem:[#allocation1 + $0x8] sm:$0xff pattern:$0x73625140] }
  0x1b   :  { %1799 = vmatpush.bf16.msra.mxu1 %v3979_v22  ;;  %v120_v51 = vpack.c.bf16 %v68_v49, %v68_v49  ;;  %73 = vst [vmem:[#allocation1] ss:$4 sm:$0xff] %v52_v41  ;;  %v118_v52 = vpack.c.bf16 %v66_v50, %v66_v50  ;;  %v71_v27 = vld.sshfl [vmem:[#allocation1 + $0x30] sm:$0xff pattern:$0x73625140]  ;;  %v53_v33 = vmul.f32 0.5, %v47_v20 }
  0x1c   :  { %1812 = vmatpush.bf16.msra.mxu2 %v3983_v24  ;;  %v69_v30 = vld.sshfl [vmem:[#allocation1 + $0x20] sm:$0xff pattern:$0x73625140]  ;;  %v72_v34 = vld.sshfl [vmem:[#allocation1 + $0x38] sm:$0xff pattern:$0x73625140] }
  0x1d   :  { %1825 = vmatpush.bf16.msra.mxu3 %v3985_v25  ;;  %v70_v35 = vld.sshfl [vmem:[#allocation1 + $0x28] sm:$0xff pattern:$0x73625140]  ;;  %v4084_v49 = vld [vmem:[#allocation4 + $0x150] sm:$0xff]  ;;  %v4100_v20 = vld [vmem:[#allocation4 + $0x188] sm:$0xff] }
  0x1e   :  { %1787 = vmatpush.bf16.msra.mxu0 %v3992_v28  ;;  %v4070_v41 = vld [vmem:[#allocation4 + $0x118] sm:$0xff]  ;;  %74 = vst [vmem:[#allocation1 + $0x20] ss:$4 sm:$0xff] %v53_v33  ;;  %v4088_v50 = vld [vmem:[#allocation4 + $0x190] sm:$0xff]  ;;  %v4102_v33 = vld [vmem:[#allocation4 + $0x1c8] sm:$0xff] }
  0x1f   :  { %1800 = vmatpush.bf16.msra.mxu1 %v3994_v29  ;;  %4967 = vst [vmem:[#allocation9_spill] sm:$0xff] %v4070_v41  ;;  %v4072_v45 = vld [vmem:[#allocation4 + $0x158] sm:$0xff] }
  0x20   :  { %1813 = vmatpush.bf16.msra.mxu2 %v4001_v31  ;;  %4968 = vst [vmem:[#allocation10_spill] sm:$0xff] %v4072_v45  ;;  %v4076_v46 = vld [vmem:[#allocation4 + $0x198] sm:$0xff] }
  0x21   :  { %1826 = vmatpush.bf16.msra.mxu3 %v4003_v32  ;;  %4969 = vst [vmem:[#allocation11_spill] sm:$0xff] %v4076_v46 }
  0x22   :  { %1788 = vmatpush.bf16.msra.mxu0 %v4007_v36  ;;  %4972 = vst [vmem:[#allocation14_spill] sm:$0xff] %v4084_v49 }
  0x23   :  { %1801 = vmatpush.bf16.msra.mxu1 %v4009_v37  ;;  %4973 = vst [vmem:[#allocation15_spill] sm:$0xff] %v4088_v50 }
  0x24   :  { %1814 = vmatpush.bf16.msra.mxu2 %v4013_v38  ;;  %4977 = vst [vmem:[#allocation19_spill] sm:$0xff] %v4100_v20 }
  0x25   :  { %1827 = vmatpush.bf16.msra.mxu3 %v4015_v39  ;;  %1789 = vmatmul.bf16.vlgmr.msra.gmra.mxu0 %v117_v48  ;;  %v4082_v48 = vld [vmem:[#allocation4 + $0x110] sm:$0xff]  ;;  %4978 = vst [vmem:[#allocation20_spill] sm:$0xff] %v4102_v33 }
  0x26   :  { %1833 = vmatpush.bf16.msrb.mxu0 %v4017_v40  ;;  %1802 = vmatmul.bf16.vlgmr.msra.gmra.mxu1 %v118_v52  ;;  %4971 = vst [vmem:[#allocation13_spill] sm:$0xff] %v4082_v48  ;;  %v4094_v52 = vld [vmem:[#allocation4 + $0x108] sm:$0xff] }
  0x27   :  { %1846 = vmatpush.bf16.msrb.mxu1 %v4019_v42  ;;  %1815 = vmatmul.bf16.vlgmr.msra.gmra.mxu2 %v119_v47  ;;  %v4078_v47 = vld [vmem:[#allocation4 + $0x1d8] sm:$0xff]  ;;  %4975 = vst [vmem:[#allocation17_spill] sm:$0xff] %v4094_v52 }
  0x28   :  { %1859 = vmatpush.bf16.msrb.mxu2 %v4021_v43  ;;  %1828 = vmatmul.bf16.vlgmr.msra.gmra.mxu3 %v120_v51  ;;  %4970 = vst [vmem:[#allocation12_spill] sm:$0xff] %v4078_v47  ;;  %v4090_v51 = vld [vmem:[#allocation4 + $0x1d0] sm:$0xff] }
  0x29   :  { %1872 = vmatpush.bf16.msrb.mxu3 %v4023_v44  ;;  %4974 = vst [vmem:[#allocation16_spill] sm:$0xff] %v4090_v51 }
  0x2a   :  { %1834 = vmatpush.bf16.msrb.mxu0 %v4031_v53 }
  0x2b   :  { %1847 = vmatpush.bf16.msrb.mxu1 %v4033_v54 }
  0x2c   :  { %1860 = vmatpush.bf16.msrb.mxu2 %v4037_v55 }
  0x2d   :  { %1873 = vmatpush.bf16.msrb.mxu3 %v4039_v56 }
  0x2e   :  { %1835 = vmatpush.bf16.msrb.mxu0 %v4043_v57 }
  0x2f   :  { %1848 = vmatpush.bf16.msrb.mxu1 %v4045_v58 }
  0x30   :  { %1861 = vmatpush.bf16.msrb.mxu2 %v4049_v59 }
  0x31   :  { %1874 = vmatpush.bf16.msrb.mxu3 %v4051_v60 }
  0x32   :  { %1836 = vmatpush.bf16.msrb.mxu0 %v4058_v62 }
  0x33   :  { %1849 = vmatpush.bf16.msrb.mxu1 %v4060_v63 }
  0x34   :  { %1862 = vmatpush.bf16.msrb.mxu2 %v4064_v23  ;;  %v4132_v23 = vld [vmem:[#allocation4 + $0x270] sm:$0xff] }
  0x35   :  { %1875 = vmatpush.bf16.msrb.mxu3 %v4066_v26  ;;  %v4130_v26 = vld [vmem:[#allocation4 + $0x230] sm:$0xff]  ;;  %4988 = vst [vmem:[#allocation30_spill] sm:$0xff] %v4132_v23 }
  0x36   :  { %1837 = vmatpush.bf16.msrb.mxu0 %v4070_v41  ;;  %v122_v41 = vpack.c.bf16 %v70_v35, %v70_v35  ;;  %4987 = vst [vmem:[#allocation29_spill] sm:$0xff] %v4130_v26  ;;  %v4144_v35 = vld [vmem:[#allocation4 + $0x268] sm:$0xff] }
  0x37   :  { %1850 = vmatpush.bf16.msrb.mxu1 %v4072_v45  ;;  %v4120_v45 = vld [vmem:[#allocation4 + $0x2b8] sm:$0xff]  ;;  %4992 = vst [vmem:[#allocation34_spill] sm:$0xff] %v4144_v35 }
  0x38   :  { %1863 = vmatpush.bf16.msrb.mxu2 %v4076_v46  ;;  %v4118_v46 = vld [vmem:[#allocation4 + $0x278] sm:$0xff]  ;;  %4985 = vst [vmem:[#allocation27_spill] sm:$0xff] %v4120_v45 }
  0x39   :  { %1876 = vmatpush.bf16.msrb.mxu3 %v4078_v47  ;;  %v4106_v47 = vld [vmem:[#allocation4 + $0x100] sm:$0xff]  ;;  %4984 = vst [vmem:[#allocation26_spill] sm:$0xff] %v4118_v46 }
  0x3a   :  { %1838 = vmatpush.bf16.msrb.mxu0 %v4082_v48  ;;  %4979 = vst [vmem:[#allocation21_spill] sm:$0xff] %v4106_v47  ;;  %v4108_v48 = vld [vmem:[#allocation4 + $0x140] sm:$0xff] }
  0x3b   :  { %1851 = vmatpush.bf16.msrb.mxu1 %v4084_v49  ;;  %4980 = vst [vmem:[#allocation22_spill] sm:$0xff] %v4108_v48  ;;  %v4112_v49 = vld [vmem:[#allocation4 + $0x180] sm:$0xff] }
  0x3c   :  { %1864 = vmatpush.bf16.msrb.mxu2 %v4088_v50  ;;  %4981 = vst [vmem:[#allocation23_spill] sm:$0xff] %v4112_v49  ;;  %v4114_v50 = vld [vmem:[#allocation4 + $0x1c0] sm:$0xff] }
  0x3d   :  { %1877 = vmatpush.bf16.msrb.mxu3 %v4090_v51  ;;  %4982 = vst [vmem:[#allocation24_spill] sm:$0xff] %v4114_v50  ;;  %v4116_v51 = vld [vmem:[#allocation4 + $0x238] sm:$0xff] }
  0x3e   :  { %1839 = vmatpush.bf16.msrb.mxu0 %v4094_v52  ;;  %4983 = vst [vmem:[#allocation25_spill] sm:$0xff] %v4116_v51  ;;  %v4122_v52 = vld [vmem:[#allocation4 + $0x2f8] sm:$0xff] }
  0x3f   :  { %1852 = vmatpush.bf16.msrb.mxu1 %v4096_v61  ;;  %4986 = vst [vmem:[#allocation28_spill] sm:$0xff] %v4122_v52  ;;  %v123_v61 = vpack.c.bf16 %v71_v27, %v71_v27  ;;  %v4136_v27 = vld [vmem:[#allocation4 + $0x2b0] sm:$0xff] }
  0x40   :  { %1865 = vmatpush.bf16.msrb.mxu2 %v4100_v20  ;;  %v121_v20 = vpack.c.bf16 %v69_v30, %v69_v30  ;;  %4989 = vst [vmem:[#allocation31_spill] sm:$0xff] %v4136_v27  ;;  %v4138_v30 = vld [vmem:[#allocation4 + $0x2f0] sm:$0xff] }
  0x41   :  { %1878 = vmatpush.bf16.msrb.mxu3 %v4102_v33  ;;  %v124_v33 = vpack.c.bf16 %v72_v34, %v72_v34  ;;  %4990 = vst [vmem:[#allocation32_spill] sm:$0xff] %v4138_v30  ;;  %v4142_v34 = vld [vmem:[#allocation4 + $0x228] sm:$0xff] }
  0x42   :  { %1840 = vmatpush.bf16.msrb.mxu0 %v4106_v47  ;;  %4991 = vst [vmem:[#allocation33_spill] sm:$0xff] %v4142_v34  ;;  %v4228_v47 = vld [vmem:[#allocation4 + $0x370] sm:$0xff] }
  0x43   :  { %1853 = vmatpush.bf16.msrb.mxu1 %v4108_v48  ;;  %v4226_v48 = vld [vmem:[#allocation4 + $0x330] sm:$0xff]  ;;  %5020 = vst [vmem:[#allocation62_spill] sm:$0xff] %v4228_v47 }
  0x44   :  { %1866 = vmatpush.bf16.msrb.mxu2 %v4112_v49  ;;  %v4218_v49 = vld [vmem:[#allocation4 + $0x3f8] sm:$0xff]  ;;  %5019 = vst [vmem:[#allocation61_spill] sm:$0xff] %v4226_v48 }
  0x45   :  { %1879 = vmatpush.bf16.msrb.mxu3 %v4114_v50  ;;  %1841 = vmatmul.bf16.vlgmr.msrb.gmra.mxu0 %v121_v20  ;;  %v4160_v20 = vld [vmem:[#allocation4 + $0x2a0] sm:$0xff]  ;;  %v4216_v50 = vld [vmem:[#allocation4 + $0x3b8] sm:$0xff]  ;;  %5018 = vst [vmem:[#allocation60_spill] sm:$0xff] %v4218_v49 }
  0x46   :  { %1885 = vmatpush.bf16.msra.mxu0 %v4116_v51  ;;  %1854 = vmatmul.bf16.vlgmr.msrb.gmra.mxu1 %v122_v41  ;;  %v4154_v41 = vld [vmem:[#allocation4 + $0x220] sm:$0xff]  ;;  %4997 = vst [vmem:[#allocation39_spill] sm:$0xff] %v4160_v20  ;;  %v78_v51 = vld.sshfl [vmem:[#allocation1 + $0x18] sm:$0xff pattern:$0x73625140] }
  0x47   :  { %1898 = vmatpush.bf16.msra.mxu1 %v4118_v46  ;;  %1867 = vmatmul.bf16.vlgmr.msrb.gmra.mxu2 %v123_v61  ;;  %4995 = vst [vmem:[#allocation37_spill] sm:$0xff] %v4154_v41  ;;  %v4156_v61 = vld [vmem:[#allocation4 + $0x260] sm:$0xff] }
  0x48   :  { %1911 = vmatpush.bf16.msra.mxu2 %v4120_v45  ;;  %1880 = vmatmul.bf16.vlgmr.msrb.gmra.mxu3 %v124_v33  ;;  %v4150_v45 = vld [vmem:[#allocation4 + $0x2e8] sm:$0xff]  ;;  %4996 = vst [vmem:[#allocation38_spill] sm:$0xff] %v4156_v61  ;;  %v4162_v33 = vld [vmem:[#allocation4 + $0x2e0] sm:$0xff] }
  0x49   :  { %1924 = vmatpush.bf16.msra.mxu3 %v4122_v52  ;;  %v4148_v52 = vld [vmem:[#allocation4 + $0x2a8] sm:$0xff]  ;;  %4994 = vst [vmem:[#allocation36_spill] sm:$0xff] %v4150_v45  ;;  %v76_v46 = vld.sshfl [vmem:[#allocation1 + $0x8] sm:$0xff pattern:$0x73625140] }
  0x4a   :  { %1886 = vmatpush.bf16.msra.mxu0 %v4130_v26  ;;  %4993 = vst [vmem:[#allocation35_spill] sm:$0xff] %v4148_v52  ;;  %v77_v26 = vld.sshfl [vmem:[#allocation1 + $0x10] sm:$0xff pattern:$0x73625140] }
  0x4b   :  { %1899 = vmatpush.bf16.msra.mxu1 %v4132_v23  ;;  %4998 = vst [vmem:[#allocation40_spill] sm:$0xff] %v4162_v33  ;;  %v4204_v23 = vld [vmem:[#allocation4 + $0x280] sm:$0xff] }
  0x4c   :  { %1912 = vmatpush.bf16.msra.mxu2 %v4136_v27  ;;  %v4202_v27 = vld [vmem:[#allocation4 + $0x240] sm:$0xff]  ;;  %5013 = vst [vmem:[#allocation55_spill] sm:$0xff] %v4204_v23 }
  0x4d   :  { %1925 = vmatpush.bf16.msra.mxu3 %v4138_v30  ;;  %v4166_v30 = vld [vmem:[#allocation4 + $0x218] sm:$0xff]  ;;  %5012 = vst [vmem:[#allocation54_spill] sm:$0xff] %v4202_v27 }
  0x4e   :  { %1887 = vmatpush.bf16.msra.mxu0 %v4142_v34  ;;  %4999 = vst [vmem:[#allocation41_spill] sm:$0xff] %v4166_v30  ;;  %v4168_v34 = vld [vmem:[#allocation4 + $0x258] sm:$0xff] }
  0x4f   :  { %1900 = vmatpush.bf16.msra.mxu1 %v4144_v35  ;;  %5000 = vst [vmem:[#allocation42_spill] sm:$0xff] %v4168_v34  ;;  %v4172_v35 = vld [vmem:[#allocation4 + $0x298] sm:$0xff] }
  0x50   :  { %1913 = vmatpush.bf16.msra.mxu2 %v4148_v52  ;;  %5001 = vst [vmem:[#allocation43_spill] sm:$0xff] %v4172_v35  ;;  %v4174_v52 = vld [vmem:[#allocation4 + $0x2d8] sm:$0xff] }
  0x51   :  { %1926 = vmatpush.bf16.msra.mxu3 %v4150_v45  ;;  %5002 = vst [vmem:[#allocation44_spill] sm:$0xff] %v4174_v52  ;;  %v4178_v45 = vld [vmem:[#allocation4 + $0x210] sm:$0xff] }
  0x52   :  { %1888 = vmatpush.bf16.msra.mxu0 %v4154_v41  ;;  %5003 = vst [vmem:[#allocation45_spill] sm:$0xff] %v4178_v45  ;;  %v4180_v41 = vld [vmem:[#allocation4 + $0x250] sm:$0xff] }
  0x53   :  { %1901 = vmatpush.bf16.msra.mxu1 %v4156_v61  ;;  %5004 = vst [vmem:[#allocation46_spill] sm:$0xff] %v4180_v41  ;;  %v4184_v61 = vld [vmem:[#allocation4 + $0x290] sm:$0xff] }
  0x54   :  { %1914 = vmatpush.bf16.msra.mxu2 %v4160_v20  ;;  %5005 = vst [vmem:[#allocation47_spill] sm:$0xff] %v4184_v61  ;;  %v4186_v20 = vld [vmem:[#allocation4 + $0x2d0] sm:$0xff] }
  0x55   :  { %1927 = vmatpush.bf16.msra.mxu3 %v4162_v33  ;;  %5006 = vst [vmem:[#allocation48_spill] sm:$0xff] %v4186_v20  ;;  %v4190_v33 = vld [vmem:[#allocation4 + $0x208] sm:$0xff] }
  0x56   :  { %1889 = vmatpush.bf16.msra.mxu0 %v4166_v30  ;;  %5007 = vst [vmem:[#allocation49_spill] sm:$0xff] %v4190_v33  ;;  %v4192_v30 = vld [vmem:[#allocation4 + $0x248] sm:$0xff] }
  0x57   :  { %1902 = vmatpush.bf16.msra.mxu1 %v4168_v34  ;;  %5008 = vst [vmem:[#allocation50_spill] sm:$0xff] %v4192_v30  ;;  %v4196_v34 = vld [vmem:[#allocation4 + $0x288] sm:$0xff] }
  0x58   :  { %1915 = vmatpush.bf16.msra.mxu2 %v4172_v35  ;;  %5009 = vst [vmem:[#allocation51_spill] sm:$0xff] %v4196_v34  ;;  %v4198_v35 = vld [vmem:[#allocation4 + $0x2c8] sm:$0xff] }
  0x59   :  { %1928 = vmatpush.bf16.msra.mxu3 %v4174_v52  ;;  %5010 = vst [vmem:[#allocation52_spill] sm:$0xff] %v4198_v35  ;;  %v4200_v52 = vld [vmem:[#allocation4 + $0x200] sm:$0xff] }
  0x5a   :  { %1890 = vmatpush.bf16.msra.mxu0 %v4178_v45  ;;  %5011 = vst [vmem:[#allocation53_spill] sm:$0xff] %v4200_v52  ;;  %v4210_v45 = vld [vmem:[#allocation4 + $0x338] sm:$0xff] }
  0x5b   :  { %1903 = vmatpush.bf16.msra.mxu1 %v4180_v41  ;;  %v4208_v41 = vld [vmem:[#allocation4 + $0x2c0] sm:$0xff]  ;;  %5015 = vst [vmem:[#allocation57_spill] sm:$0xff] %v4210_v45 }
  0x5c   :  { %1916 = vmatpush.bf16.msra.mxu2 %v4184_v61  ;;  %5014 = vst [vmem:[#allocation56_spill] sm:$0xff] %v4208_v41  ;;  %v4212_v61 = vld [vmem:[#allocation4 + $0x378] sm:$0xff] }
  0x5d   :  { %1929 = vmatpush.bf16.msra.mxu3 %v4186_v20  ;;  %5016 = vst [vmem:[#allocation58_spill] sm:$0xff] %v4212_v61  ;;  %v75_v20 = vld.sshfl [vmem:[#allocation1] sm:$0xff pattern:$0x73625140] }
  0x5e   :  { %1891 = vmatpush.bf16.msra.mxu0 %v4190_v33  ;;  %5017 = vst [vmem:[#allocation59_spill] sm:$0xff] %v4216_v50  ;;  %v127_v33 = vpack.c.bf16 %v77_v26, %v77_v26  ;;  %v4234_v26 = vld [vmem:[#allocation4 + $0x3f0] sm:$0xff] }
  0x5f   :  { %1904 = vmatpush.bf16.msra.mxu1 %v4192_v30  ;;  %v125_v30 = vpack.c.bf16 %v75_v20, %v75_v20  ;;  %v4232_v20 = vld [vmem:[#allocation4 + $0x3b0] sm:$0xff]  ;;  %5022 = vst [vmem:[#allocation64_spill] sm:$0xff] %v4234_v26 }
  0x60   :  { %1917 = vmatpush.bf16.msra.mxu2 %v4196_v34  ;;  %v126_v34 = vpack.c.bf16 %v76_v46, %v76_v46  ;;  %5021 = vst [vmem:[#allocation63_spill] sm:$0xff] %v4232_v20  ;;  %v4238_v46 = vld [vmem:[#allocation4 + $0x328] sm:$0xff] }
  0x61   :  { %1930 = vmatpush.bf16.msra.mxu3 %v4198_v35  ;;  %v128_v35 = vpack.c.bf16 %v78_v51, %v78_v51  ;;  %5023 = vst [vmem:[#allocation65_spill] sm:$0xff] %v4238_v46  ;;  %v4240_v51 = vld [vmem:[#allocation4 + $0x368] sm:$0xff] }
  0x62   :  { %1892 = vmatpush.bf16.msra.mxu0 %v4200_v52  ;;  %5024 = vst [vmem:[#allocation66_spill] sm:$0xff] %v4240_v51  ;;  %v4327_v52 = vld [vmem:[#allocation4 + $0x470] sm:$0xff] }
  0x63   :  { %1905 = vmatpush.bf16.msra.mxu1 %v4202_v27  ;;  %v4325_v27 = vld [vmem:[#allocation4 + $0x430] sm:$0xff]  ;;  %5052 = vst [vmem:[#allocation94_spill] sm:$0xff] %v4327_v52 }
  0x64   :  { %1918 = vmatpush.bf16.msra.mxu2 %v4204_v23  ;;  %v4317_v23 = vld [vmem:[#allocation4 + $0x4f8] sm:$0xff]  ;;  %5051 = vst [vmem:[#allocation93_spill] sm:$0xff] %v4325_v27 }
  0x65   :  { %1931 = vmatpush.bf16.msra.mxu3 %v4208_v41  ;;  %1893 = vmatmul.bf16.vlgmr.msra.gmra.mxu0 %v125_v30  ;;  %v4250_v30 = vld [vmem:[#allocation4 + $0x320] sm:$0xff]  ;;  %v4315_v41 = vld [vmem:[#allocation4 + $0x4b8] sm:$0xff]  ;;  %5050 = vst [vmem:[#allocation92_spill] sm:$0xff] %v4317_v23 }
  0x66   :  { %1937 = vmatpush.bf16.msrb.mxu0 %v4210_v45  ;;  %1906 = vmatmul.bf16.vlgmr.msra.gmra.mxu1 %v126_v34  ;;  %5027 = vst [vmem:[#allocation69_spill] sm:$0xff] %v4250_v30  ;;  %v4252_v34 = vld [vmem:[#allocation4 + $0x360] sm:$0xff]  ;;  %v82_v45 = vld.sshfl [vmem:[#allocation1 + $0x38] sm:$0xff pattern:$0x73625140] }
  0x67   :  { %1950 = vmatpush.bf16.msrb.mxu1 %v4212_v61  ;;  %1919 = vmatmul.bf16.vlgmr.msra.gmra.mxu2 %v127_v33  ;;  %5028 = vst [vmem:[#allocation70_spill] sm:$0xff] %v4252_v34  ;;  %v4258_v33 = vld [vmem:[#allocation4 + $0x3e0] sm:$0xff] }
  0x68   :  { %1963 = vmatpush.bf16.msrb.mxu2 %v4216_v50  ;;  %1932 = vmatmul.bf16.vlgmr.msra.gmra.mxu3 %v128_v35  ;;  %v4246_v50 = vld [vmem:[#allocation4 + $0x3e8] sm:$0xff]  ;;  %v4256_v35 = vld [vmem:[#allocation4 + $0x3a0] sm:$0xff]  ;;  %5030 = vst [vmem:[#allocation72_spill] sm:$0xff] %v4258_v33 }
  0x69   :  { %1976 = vmatpush.bf16.msrb.mxu3 %v4218_v49  ;;  %v4244_v49 = vld [vmem:[#allocation4 + $0x3a8] sm:$0xff]  ;;  %5026 = vst [vmem:[#allocation68_spill] sm:$0xff] %v4246_v50  ;;  %v80_v61 = vld.sshfl [vmem:[#allocation1 + $0x28] sm:$0xff pattern:$0x73625140] }
  0x6a   :  { %1938 = vmatpush.bf16.msrb.mxu0 %v4226_v48  ;;  %5025 = vst [vmem:[#allocation67_spill] sm:$0xff] %v4244_v49  ;;  %v4299_v48 = vld [vmem:[#allocation4 + $0x300] sm:$0xff] }
  0x6b   :  { %1951 = vmatpush.bf16.msrb.mxu1 %v4228_v47  ;;  %5029 = vst [vmem:[#allocation71_spill] sm:$0xff] %v4256_v35  ;;  %v4291_v47 = vld [vmem:[#allocation4 + $0x348] sm:$0xff] }
  0x6c   :  { %1964 = vmatpush.bf16.msrb.mxu2 %v4232_v20  ;;  %5040 = vst [vmem:[#allocation82_spill] sm:$0xff] %v4291_v47 }
  0x6d   :  { %1977 = vmatpush.bf16.msrb.mxu3 %v4234_v26  ;;  %v4262_v26 = vld [vmem:[#allocation4 + $0x318] sm:$0xff]  ;;  %5043 = vst [vmem:[#allocation85_spill] sm:$0xff] %v4299_v48 }
  0x6e   :  { %1939 = vmatpush.bf16.msrb.mxu0 %v4238_v46  ;;  %5031 = vst [vmem:[#allocation73_spill] sm:$0xff] %v4262_v26  ;;  %v4264_v46 = vld [vmem:[#allocation4 + $0x358] sm:$0xff] }
  0x6f   :  { %1952 = vmatpush.bf16.msrb.mxu1 %v4240_v51  ;;  %5032 = vst [vmem:[#allocation74_spill] sm:$0xff] %v4264_v46  ;;  %v4268_v51 = vld [vmem:[#allocation4 + $0x398] sm:$0xff] }
  0x70   :  { %1965 = vmatpush.bf16.msrb.mxu2 %v4244_v49  ;;  %5033 = vst [vmem:[#allocation75_spill] sm:$0xff] %v4268_v51  ;;  %v4270_v49 = vld [vmem:[#allocation4 + $0x3d8] sm:$0xff] }
  0x71   :  { %1978 = vmatpush.bf16.msrb.mxu3 %v4246_v50  ;;  %5034 = vst [vmem:[#allocation76_spill] sm:$0xff] %v4270_v49  ;;  %v4274_v50 = vld [vmem:[#allocation4 + $0x310] sm:$0xff] }
  0x72   :  { %1940 = vmatpush.bf16.msrb.mxu0 %v4250_v30  ;;  %5035 = vst [vmem:[#allocation77_spill] sm:$0xff] %v4274_v50  ;;  %v4276_v30 = vld [vmem:[#allocation4 + $0x350] sm:$0xff] }
  0x73   :  { %1953 = vmatpush.bf16.msrb.mxu1 %v4252_v34  ;;  %5036 = vst [vmem:[#allocation78_spill] sm:$0xff] %v4276_v30  ;;  %v42_v34 = vld [vmem:[%s4820_s0 + $0x20] sm:$0xff] }
  0x74   :  { %1966 = vmatpush.bf16.msrb.mxu2 %v4256_v35  ;;  %v4285_v35 = vld [vmem:[#allocation4 + $0x3d0] sm:$0xff]  ;;  %v48_v20 = vadd.f32 1.0, %v42_v34  ;;  %v4303_v34 = vld [vmem:[#allocation4 + $0x380] sm:$0xff]  ;;  %5049 = vst [vmem:[#allocation91_spill] sm:$0xff] %v4315_v41 }
  0x75   :  { %1979 = vmatpush.bf16.msrb.mxu3 %v4258_v33  ;;  %v4283_v33 = vld [vmem:[#allocation4 + $0x390] sm:$0xff]  ;;  %5038 = vst [vmem:[#allocation80_spill] sm:$0xff] %v4285_v35 }
  0x76   :  { %1941 = vmatpush.bf16.msrb.mxu0 %v4262_v26  ;;  %5037 = vst [vmem:[#allocation79_spill] sm:$0xff] %v4283_v33  ;;  %v54_v26 = vmul.f32 0.5, %v48_v20  ;;  %v4301_v20 = vld [vmem:[#allocation4 + $0x340] sm:$0xff] }
  0x77   :  { %1954 = vmatpush.bf16.msrb.mxu1 %v4264_v46  ;;  %v4289_v46 = vld [vmem:[#allocation4 + $0x308] sm:$0xff]  ;;  %5044 = vst [vmem:[#allocation86_spill] sm:$0xff] %v4301_v20 }
  0x78   :  { %1967 = vmatpush.bf16.msrb.mxu2 %v4268_v51  ;;  %5039 = vst [vmem:[#allocation81_spill] sm:$0xff] %v4289_v46  ;;  %v4295_v51 = vld [vmem:[#allocation4 + $0x388] sm:$0xff] }
  0x79   :  { %1980 = vmatpush.bf16.msrb.mxu3 %v4270_v49  ;;  %5041 = vst [vmem:[#allocation83_spill] sm:$0xff] %v4295_v51  ;;  %v4297_v49 = vld [vmem:[#allocation4 + $0x3c8] sm:$0xff] }
  0x7a   :  { %1942 = vmatpush.bf16.msrb.mxu0 %v4274_v50  ;;  %5042 = vst [vmem:[#allocation84_spill] sm:$0xff] %v4297_v49  ;;  %v81_v50 = vld.sshfl [vmem:[#allocation1 + $0x30] sm:$0xff pattern:$0x73625140] }
  0x7b   :  { %1955 = vmatpush.bf16.msrb.mxu1 %v4276_v30  ;;  %83 = vst [vmem:[#allocation1] ss:$4 sm:$0xff] %v54_v26  ;;  %v4307_v30 = vld [vmem:[#allocation4 + $0x3c0] sm:$0xff]  ;;  %v79_v26 = vld.sshfl [vmem:[#allocation1 + $0x20] sm:$0xff pattern:$0x73625140] }
  0x7c   :  { %1968 = vmatpush.bf16.msrb.mxu2 %v4283_v33  ;;  %5045 = vst [vmem:[#allocation87_spill] sm:$0xff] %v4303_v34  ;;  %v4309_v33 = vld [vmem:[#allocation4 + $0x438] sm:$0xff] }
  0x7d   :  { %1981 = vmatpush.bf16.msrb.mxu3 %v4285_v35  ;;  %5046 = vst [vmem:[#allocation88_spill] sm:$0xff] %v4307_v30  ;;  %v4311_v35 = vld [vmem:[#allocation4 + $0x478] sm:$0xff] }
  0x7e   :  { %1943 = vmatpush.bf16.msrb.mxu0 %v4289_v46  ;;  %5047 = vst [vmem:[#allocation89_spill] sm:$0xff] %v4309_v33  ;;  %v131_v46 = vpack.c.bf16 %v81_v50, %v81_v50  ;;  %v4333_v50 = vld [vmem:[#allocation4 + $0x4f0] sm:$0xff] }
  0x7f   :  { %1956 = vmatpush.bf16.msrb.mxu1 %v4291_v47  ;;  %5048 = vst [vmem:[#allocation90_spill] sm:$0xff] %v4311_v35  ;;  %v129_v47 = vpack.c.bf16 %v79_v26, %v79_v26  ;;  %v4331_v26 = vld [vmem:[#allocation4 + $0x4b0] sm:$0xff] }
  0x80   :  { %1969 = vmatpush.bf16.msrb.mxu2 %v4295_v51  ;;  %v130_v51 = vpack.c.bf16 %v80_v61, %v80_v61  ;;  %5053 = vst [vmem:[#allocation95_spill] sm:$0xff] %v4331_v26  ;;  %v4339_v61 = vld [vmem:[#allocation4 + $0x468] sm:$0xff] }
  0x81   :  { %1982 = vmatpush.bf16.msrb.mxu3 %v4297_v49  ;;  %v132_v49 = vpack.c.bf16 %v82_v45, %v82_v45  ;;  %5054 = vst [vmem:[#allocation96_spill] sm:$0xff] %v4333_v50  ;;  %v4337_v45 = vld [vmem:[#allocation4 + $0x428] sm:$0xff] }
  0x82   :  { %1944 = vmatpush.bf16.msrb.mxu0 %v4299_v48  ;;  %5055 = vst [vmem:[#allocation97_spill] sm:$0xff] %v4337_v45  ;;  %v4426_v48 = vld [vmem:[#allocation4 + $0x570] sm:$0xff] }
  0x83   :  { %1957 = vmatpush.bf16.msrb.mxu1 %v4301_v20  ;;  %5056 = vst [vmem:[#allocation98_spill] sm:$0xff] %v4339_v61  ;;  %v4424_v20 = vld [vmem:[#allocation4 + $0x530] sm:$0xff] }
  0x84   :  { %1970 = vmatpush.bf16.msrb.mxu2 %v4303_v34  ;;  %v4416_v34 = vld [vmem:[#allocation4 + $0x5f8] sm:$0xff]  ;;  %5083 = vst [vmem:[#allocation125_spill] sm:$0xff] %v4424_v20 }
  0x85   :  { %1983 = vmatpush.bf16.msrb.mxu3 %v4307_v30  ;;  %1945 = vmatmul.bf16.vlgmr.msrb.gmra.mxu0 %v129_v47  ;;  %v4349_v47 = vld [vmem:[#allocation4 + $0x420] sm:$0xff]  ;;  %v4414_v30 = vld [vmem:[#allocation4 + $0x5b8] sm:$0xff]  ;;  %5082 = vst [vmem:[#allocation124_spill] sm:$0xff] %v4416_v34 }
  0x86   :  { %1989 = vmatpush.bf16.msra.mxu0 %v4309_v33  ;;  %1958 = vmatmul.bf16.vlgmr.msrb.gmra.mxu1 %v130_v51  ;;  %5059 = vst [vmem:[#allocation101_spill] sm:$0xff] %v4349_v47  ;;  %v4357_v51 = vld [vmem:[#allocation4 + $0x4e0] sm:$0xff]  ;;  %v88_v33 = vld.sshfl [vmem:[#allocation1 + $0x18] sm:$0xff pattern:$0x73625140] }
  0x87   :  { %2002 = vmatpush.bf16.msra.mxu1 %v4311_v35  ;;  %1971 = vmatmul.bf16.vlgmr.msrb.gmra.mxu2 %v131_v46  ;;  %v4355_v46 = vld [vmem:[#allocation4 + $0x4a0] sm:$0xff]  ;;  %5062 = vst [vmem:[#allocation104_spill] sm:$0xff] %v4357_v51 }
  0x88   :  { %2015 = vmatpush.bf16.msra.mxu2 %v4315_v41  ;;  %1984 = vmatmul.bf16.vlgmr.msrb.gmra.mxu3 %v132_v49  ;;  %v4345_v41 = vld [vmem:[#allocation4 + $0x4e8] sm:$0xff]  ;;  %v4351_v49 = vld [vmem:[#allocation4 + $0x460] sm:$0xff]  ;;  %5061 = vst [vmem:[#allocation103_spill] sm:$0xff] %v4355_v46 }
  0x89   :  { %2028 = vmatpush.bf16.msra.mxu3 %v4317_v23  ;;  %v4343_v23 = vld [vmem:[#allocation4 + $0x4a8] sm:$0xff]  ;;  %5058 = vst [vmem:[#allocation100_spill] sm:$0xff] %v4345_v41  ;;  %v86_v35 = vld.sshfl [vmem:[#allocation1 + $0x8] sm:$0xff pattern:$0x73625140] }
  0x8a   :  { %1990 = vmatpush.bf16.msra.mxu0 %v4325_v27  ;;  %5057 = vst [vmem:[#allocation99_spill] sm:$0xff] %v4343_v23  ;;  %v4398_v27 = vld [vmem:[#allocation4 + $0x400] sm:$0xff] }
  0x8b   :  { %2003 = vmatpush.bf16.msra.mxu1 %v4327_v52  ;;  %5060 = vst [vmem:[#allocation102_spill] sm:$0xff] %v4351_v49  ;;  %v4390_v52 = vld [vmem:[#allocation4 + $0x448] sm:$0xff] }
  0x8c   :  { %2016 = vmatpush.bf16.msra.mxu2 %v4331_v26  ;;  %5072 = vst [vmem:[#allocation114_spill] sm:$0xff] %v4390_v52 }
  0x8d   :  { %2029 = vmatpush.bf16.msra.mxu3 %v4333_v50  ;;  %v4361_v50 = vld [vmem:[#allocation4 + $0x418] sm:$0xff]  ;;  %5075 = vst [vmem:[#allocation117_spill] sm:$0xff] %v4398_v27 }
  0x8e   :  { %1991 = vmatpush.bf16.msra.mxu0 %v4337_v45  ;;  %5063 = vst [vmem:[#allocation105_spill] sm:$0xff] %v4361_v50  ;;  %v4363_v45 = vld [vmem:[#allocation4 + $0x458] sm:$0xff] }
  0x8f   :  { %2004 = vmatpush.bf16.msra.mxu1 %v4339_v61  ;;  %5064 = vst [vmem:[#allocation106_spill] sm:$0xff] %v4363_v45  ;;  %v4367_v61 = vld [vmem:[#allocation4 + $0x498] sm:$0xff] }
  0x90   :  { %2017 = vmatpush.bf16.msra.mxu2 %v4343_v23  ;;  %5065 = vst [vmem:[#allocation107_spill] sm:$0xff] %v4367_v61  ;;  %v4369_v23 = vld [vmem:[#allocation4 + $0x4d8] sm:$0xff] }
  0x91   :  { %2030 = vmatpush.bf16.msra.mxu3 %v4345_v41  ;;  %5066 = vst [vmem:[#allocation108_spill] sm:$0xff] %v4369_v23  ;;  %v4373_v41 = vld [vmem:[#allocation4 + $0x410] sm:$0xff] }
  0x92   :  { %1992 = vmatpush.bf16.msra.mxu0 %v4349_v47  ;;  %5067 = vst [vmem:[#allocation109_spill] sm:$0xff] %v4373_v41  ;;  %v4375_v47 = vld [vmem:[#allocation4 + $0x450] sm:$0xff] }
  0x93   :  { %2005 = vmatpush.bf16.msra.mxu1 %v4351_v49  ;;  %5068 = vst [vmem:[#allocation110_spill] sm:$0xff] %v4375_v47  ;;  %v43_v49 = vld [vmem:[%s4820_s0 + $0x28] sm:$0xff] }
  0x94   :  { %2018 = vmatpush.bf16.msra.mxu2 %v4355_v46  ;;  %v4384_v46 = vld [vmem:[#allocation4 + $0x4d0] sm:$0xff]  ;;  %v49_v26 = vadd.f32 1.0, %v43_v49  ;;  %v4402_v49 = vld [vmem:[#allocation4 + $0x480] sm:$0xff]  ;;  %5081 = vst [vmem:[#allocation123_spill] sm:$0xff] %v4414_v30 }
  0x95   :  { %2031 = vmatpush.bf16.msra.mxu3 %v4357_v51  ;;  %v4382_v51 = vld [vmem:[#allocation4 + $0x490] sm:$0xff]  ;;  %5070 = vst [vmem:[#allocation112_spill] sm:$0xff] %v4384_v46 }
  0x96   :  { %1993 = vmatpush.bf16.msra.mxu0 %v4361_v50  ;;  %5069 = vst [vmem:[#allocation111_spill] sm:$0xff] %v4382_v51  ;;  %v55_v50 = vmul.f32 0.5, %v49_v26  ;;  %v4400_v26 = vld [vmem:[#allocation4 + $0x440] sm:$0xff] }
  0x97   :  { %2006 = vmatpush.bf16.msra.mxu1 %v4363_v45  ;;  %v4388_v45 = vld [vmem:[#allocation4 + $0x408] sm:$0xff]  ;;  %5076 = vst [vmem:[#allocation118_spill] sm:$0xff] %v4400_v26 }
  0x98   :  { %2019 = vmatpush.bf16.msra.mxu2 %v4367_v61  ;;  %5071 = vst [vmem:[#allocation113_spill] sm:$0xff] %v4388_v45  ;;  %v4394_v61 = vld [vmem:[#allocation4 + $0x488] sm:$0xff] }
  0x99   :  { %2032 = vmatpush.bf16.msra.mxu3 %v4369_v23  ;;  %5073 = vst [vmem:[#allocation115_spill] sm:$0xff] %v4394_v61  ;;  %v4396_v23 = vld [vmem:[#allocation4 + $0x4c8] sm:$0xff] }
  0x9a   :  { %1994 = vmatpush.bf16.msra.mxu0 %v4373_v41  ;;  %5074 = vst [vmem:[#allocation116_spill] sm:$0xff] %v4396_v23  ;;  %v87_v41 = vld.sshfl [vmem:[#allocation1 + $0x10] sm:$0xff pattern:$0x73625140] }
  0x9b   :  { %2007 = vmatpush.bf16.msra.mxu1 %v4375_v47  ;;  %84 = vst [vmem:[#allocation1 + $0x20] ss:$4 sm:$0xff] %v55_v50  ;;  %v4406_v47 = vld [vmem:[#allocation4 + $0x4c0] sm:$0xff]  ;;  %v85_v50 = vld.sshfl [vmem:[#allocation1] sm:$0xff pattern:$0x73625140] }
  0x9c   :  { %2020 = vmatpush.bf16.msra.mxu2 %v4382_v51  ;;  %5077 = vst [vmem:[#allocation119_spill] sm:$0xff] %v4402_v49  ;;  %v4408_v51 = vld [vmem:[#allocation4 + $0x538] sm:$0xff] }
  0x9d   :  { %2033 = vmatpush.bf16.msra.mxu3 %v4384_v46  ;;  %5078 = vst [vmem:[#allocation120_spill] sm:$0xff] %v4406_v47  ;;  %v4410_v46 = vld [vmem:[#allocation4 + $0x578] sm:$0xff] }
  0x9e   :  { %1995 = vmatpush.bf16.msra.mxu0 %v4388_v45  ;;  %5079 = vst [vmem:[#allocation121_spill] sm:$0xff] %v4408_v51  ;;  %v135_v45 = vpack.c.bf16 %v87_v41, %v87_v41  ;;  %v4432_v41 = vld [vmem:[#allocation4 + $0x5f0] sm:$0xff] }
  0x9f   :  { %2008 = vmatpush.bf16.msra.mxu1 %v4390_v52  ;;  %5080 = vst [vmem:[#allocation122_spill] sm:$0xff] %v4410_v46  ;;  %v133_v52 = vpack.c.bf16 %v85_v50, %v85_v50  ;;  %v4430_v50 = vld [vmem:[#allocation4 + $0x5b0] sm:$0xff] }
  0xa0   :  { %2021 = vmatpush.bf16.msra.mxu2 %v4394_v61  ;;  %v134_v61 = vpack.c.bf16 %v86_v35, %v86_v35  ;;  %5084 = vst [vmem:[#allocation126_spill] sm:$0xff] %v4426_v48  ;;  %v4436_v35 = vld [vmem:[#allocation4 + $0x528] sm:$0xff] }
  0xa1   :  { %2034 = vmatpush.bf16.msra.mxu3 %v4396_v23  ;;  %v136_v23 = vpack.c.bf16 %v88_v33, %v88_v33  ;;  %5085 = vst [vmem:[#allocation127_spill] sm:$0xff] %v4430_v50  ;;  %v4438_v33 = vld [vmem:[#allocation4 + $0x568] sm:$0xff] }
  0xa2   :  { %1996 = vmatpush.bf16.msra.mxu0 %v4398_v27  ;;  %5086 = vst [vmem:[#allocation128_spill] sm:$0xff] %v4432_v41 }
  0xa3   :  { %2009 = vmatpush.bf16.msra.mxu1 %v4400_v26  ;;  %5087 = vst [vmem:[#allocation129_spill] sm:$0xff] %v4436_v35 }
  0xa4   :  { %2022 = vmatpush.bf16.msra.mxu2 %v4402_v49  ;;  %5088 = vst [vmem:[#allocation130_spill] sm:$0xff] %v4438_v33  ;;  %v4510_v49 = vld [vmem:[#allocation4 + $0x5c0] sm:$0xff] }
  0xa5   :  { %2035 = vmatpush.bf16.msra.mxu3 %v4406_v47  ;;  %1997 = vmatmul.bf16.vlgmr.msra.gmra.mxu0 %v133_v52  ;;  %v4446_v52 = vpop.f32.mrf.mxu0  ;;  %v4502_v47 = vld [vmem:[#allocation4 + $0x500] sm:$0xff] }
  0xa6   :  { %2041 = vmatpush.bf16.msrb.mxu0 %v4408_v51  ;;  %2010 = vmatmul.bf16.vlgmr.msra.gmra.mxu1 %v134_v61  ;;  %v4454_v61 = vpop.f32.mrf.mxu1  ;;  %v4488_v51 = vld [vmem:[#allocation4 + $0x5d0] sm:$0xff] }
  0xa7   :  { %2054 = vmatpush.bf16.msrb.mxu1 %v4410_v46  ;;  %2023 = vmatmul.bf16.vlgmr.msra.gmra.mxu2 %v135_v45  ;;  %v4452_v45 = vld [vmem:[#allocation4 + $0x560] sm:$0xff]  ;;  %5102 = vst [vmem:[#allocation144_spill] sm:$0xff] %v4488_v51 }
  0xa8   :  { %2067 = vmatpush.bf16.msrb.mxu2 %v4414_v30  ;;  %2036 = vmatmul.bf16.vlgmr.msra.gmra.mxu3 %v136_v23  ;;  %v4444_v30 = vld [vmem:[#allocation4 + $0x5e8] sm:$0xff]  ;;  %v4450_v23 = vld [vmem:[#allocation4 + $0x520] sm:$0xff]  ;;  %5092 = vst [vmem:[#allocation134_spill] sm:$0xff] %v4452_v45 }
  0xa9   :  { %2080 = vmatpush.bf16.msrb.mxu3 %v4416_v34  ;;  %v4442_v34 = vld [vmem:[#allocation4 + $0x5a8] sm:$0xff]  ;;  %5090 = vst [vmem:[#allocation132_spill] sm:$0xff] %v4444_v30 }
  0xaa   :  { %2042 = vmatpush.bf16.msrb.mxu0 %v4424_v20  ;;  %5089 = vst [vmem:[#allocation131_spill] sm:$0xff] %v4442_v34 }
  0xab   :  { %2055 = vmatpush.bf16.msrb.mxu1 %v4426_v48  ;;  %5091 = vst [vmem:[#allocation133_spill] sm:$0xff] %v4450_v23  ;;  %v4470_v48 = vld [vmem:[#allocation4 + $0x598] sm:$0xff]  ;;  %v4476_v20 = vpop.f32.mrf.mxu3 }
  0xac   :  { %2068 = vmatpush.bf16.msrb.mxu2 %v4430_v50  ;;  %v4460_v50 = vld [vmem:[#allocation4 + $0x5e0] sm:$0xff]  ;;  %5097 = vst [vmem:[#allocation139_spill] sm:$0xff] %v4470_v48 }
  0xad   :  { %2081 = vmatpush.bf16.msrb.mxu3 %v4432_v41  ;;  %v4458_v41 = vld [vmem:[#allocation4 + $0x5a0] sm:$0xff]  ;;  %5094 = vst [vmem:[#allocation136_spill] sm:$0xff] %v4460_v50  ;;  %v1792_v46 = vpop.f32.mrf.mxu0 }
  0xae   :  { %2043 = vmatpush.bf16.msrb.mxu0 %v4436_v35  ;;  %5093 = vst [vmem:[#allocation135_spill] sm:$0xff] %v4458_v41  ;;  %v4464_v35 = vld [vmem:[#allocation4 + $0x518] sm:$0xff]  ;;  %v4492_v46 = vld [vmem:[#allocation4 + $0x508] sm:$0xff] }
  0xaf   :  { %2056 = vmatpush.bf16.msrb.mxu1 %v4438_v33  ;;  %5095 = vst [vmem:[#allocation137_spill] sm:$0xff] %v4464_v35  ;;  %v4466_v33 = vld [vmem:[#allocation4 + $0x558] sm:$0xff] }
  0xb0   :  { %2069 = vmatpush.bf16.msrb.mxu2 %v4442_v34  ;;  %5096 = vst [vmem:[#allocation138_spill] sm:$0xff] %v4466_v33  ;;  %v4472_v34 = vld [vmem:[#allocation4 + $0x5d8] sm:$0xff] }
  0xb1   :  { %2082 = vmatpush.bf16.msrb.mxu3 %v4444_v30  ;;  %5098 = vst [vmem:[#allocation140_spill] sm:$0xff] %v4472_v34  ;;  %v4474_v30 = vpop.f32.mrf.mxu2 }
  0xb2   :  { %2044 = vmatpush.bf16.msrb.mxu0 %v4450_v23  ;;  %v4482_v23 = vld [vmem:[#allocation4 + $0x550] sm:$0xff]  ;;  %5103 = vst [vmem:[#allocation145_spill] sm:$0xff] %v4492_v46 }
  0xb3   :  { %2057 = vmatpush.bf16.msrb.mxu1 %v4452_v45  ;;  %v4480_v45 = vld [vmem:[#allocation4 + $0x510] sm:$0xff]  ;;  %5100 = vst [vmem:[#allocation142_spill] sm:$0xff] %v4482_v23 }
  0xb4   :  { %2070 = vmatpush.bf16.msrb.mxu2 %v4458_v41  ;;  %5099 = vst [vmem:[#allocation141_spill] sm:$0xff] %v4480_v45  ;;  %v1805_v41 = vpop.f32.mrf.mxu1 }
  0xb5   :  { %2083 = vmatpush.bf16.msrb.mxu3 %v4460_v50  ;;  %v4486_v50 = vld [vmem:[#allocation4 + $0x590] sm:$0xff]  ;;  %v4498_v41 = vld [vmem:[#allocation4 + $0x588] sm:$0xff] }
  0xb6   :  { %2045 = vmatpush.bf16.msrb.mxu0 %v4464_v35  ;;  %5101 = vst [vmem:[#allocation143_spill] sm:$0xff] %v4486_v50  ;;  %v1831_v35 = vpop.f32.mrf.mxu3 }
  0xb7   :  { %2058 = vmatpush.bf16.msrb.mxu1 %v4466_v33  ;;  %v4494_v33 = vld [vmem:[#allocation4 + $0x548] sm:$0xff] }
  0xb8   :  { %2071 = vmatpush.bf16.msrb.mxu2 %v4470_v48  ;;  %5104 = vst [vmem:[#allocation146_spill] sm:$0xff] %v4494_v33  ;;  %v4500_v48 = vld [vmem:[#allocation4 + $0x5c8] sm:$0xff] }
  0xb9   :  { %2084 = vmatpush.bf16.msrb.mxu3 %v4472_v34  ;;  %v1818_v34 = vpop.f32.mrf.mxu2  ;;  %v92_v35 = vld.sshfl [vmem:[#allocation1 + $0x38] sm:$0xff pattern:$0x73625140] }
  0xba   :  { %2046 = vmatpush.bf16.msrb.mxu0 %v4480_v45  ;;  %v4508_v45 = vld [vmem:[#allocation4 + $0x580] sm:$0xff]  ;;  %v140_v27 = vpack.c.bf16 %v92_v35, %v92_v35 }
  0xbb   :  { %2059 = vmatpush.bf16.msrb.mxu1 %v4482_v23  ;;  %v4506_v23 = vld [vmem:[#allocation4 + $0x540] sm:$0xff] }
  0xbc   :  { %2072 = vmatpush.bf16.msrb.mxu2 %v4486_v50  ;;  %v91_v50 = vld.sshfl [vmem:[#allocation1 + $0x30] sm:$0xff pattern:$0x73625140]  ;;  %v90_v34 = vld.sshfl [vmem:[#allocation1 + $0x28] sm:$0xff pattern:$0x73625140] }
  0xbd   :  { %2085 = vmatpush.bf16.msrb.mxu3 %v4488_v51  ;;  %v89_v51 = vld.sshfl [vmem:[#allocation1 + $0x20] sm:$0xff pattern:$0x73625140]  ;;  %v138_v26 = vpack.c.bf16 %v90_v34, %v90_v34 }
  0xbe   :  { %2047 = vmatpush.bf16.msrb.mxu0 %v4492_v46  ;;  %v137_v46 = vpack.c.bf16 %v89_v51, %v89_v51  ;;  %v141_v51 = vld [vmem:[%s4821_s1] sm:$0xff] }
  0xbf   :  { %2060 = vmatpush.bf16.msrb.mxu1 %v4494_v33  ;;  %v139_v33 = vpack.c.bf16 %v91_v50, %v91_v50  ;;  %v147_v50 = vadd.f32 1.0, %v141_v51  ;;  %v5120_v34 = vld [vmem:[#allocation22_spill] sm:$0xff] }
  0xc0   :  { %2073 = vmatpush.bf16.msrb.mxu2 %v4498_v41 }
  0xc1   :  { %2086 = vmatpush.bf16.msrb.mxu3 %v4500_v48 }
  0xc2   :  { %2048 = vmatpush.bf16.msrb.mxu0 %v4502_v47 }
  0xc3   :  { %2061 = vmatpush.bf16.msrb.mxu1 %v4506_v23 }
  0xc4   :  { %2074 = vmatpush.bf16.msrb.mxu2 %v4508_v45 }
  0xc5   :  { %2087 = vmatpush.bf16.msrb.mxu3 %v4510_v49  ;;  %2049 = vmatmul.bf16.vlgmr.msrb.gmra.mxu0 %v137_v46  ;;  %v5119_v46 = vld [vmem:[#allocation21_spill] sm:$0xff] }
  0xc6   :  { %2096 = vmatpush.bf16.msra.mxu0 %v3916_v0  ;;  %2062 = vmatmul.bf16.vlgmr.msrb.gmra.mxu1 %v138_v26  ;;  %v153_v0 = vmul.f32 0.5, %v147_v50  ;;  %v5121_v50 = vld [vmem:[#allocation23_spill] sm:$0xff] }
  0xc7   :  { %2109 = vmatpush.bf16.msra.mxu1 %v3918_v1  ;;  %2075 = vmatmul.bf16.vlgmr.msrb.gmra.mxu2 %v139_v33  ;;  %v4529_v1 = vpop.f32.mrf.mxu0 }
  0xc8   :  { %2122 = vmatpush.bf16.msra.mxu2 %v3920_v2  ;;  %2088 = vmatmul.bf16.vlgmr.msrb.gmra.mxu3 %v140_v27  ;;  %v4533_v2 = vpop.f32.mrf.mxu1  ;;  %165 = vst [vmem:[#allocation1] ss:$4 sm:$0xff] %v153_v0  ;;  %v5122_v0 = vld [vmem:[#allocation24_spill] sm:$0xff] }
  0xc9   :  { %2135 = vmatpush.bf16.msra.mxu3 %v3922_v3 }
  0xca   :  { %2097 = vmatpush.bf16.msra.mxu0 %v3926_v4  ;;  %v4541_v3 = vpop.f32.mrf.mxu2 }
  0xcb   :  { %2110 = vmatpush.bf16.msra.mxu1 %v3928_v5  ;;  %v4543_v4 = vpop.f32.mrf.mxu3 }
  0xcc   :  { %2123 = vmatpush.bf16.msra.mxu2 %v3932_v6 }
  0xcd   :  { %2136 = vmatpush.bf16.msra.mxu3 %v3934_v7  ;;  %v142_v7 = vld [vmem:[%s4821_s1 + $0x8] sm:$0xff] }
  0xce   :  { %2098 = vmatpush.bf16.msra.mxu0 %v3938_v8 }
  0xcf   :  { %2111 = vmatpush.bf16.msra.mxu1 %v3940_v9  ;;  %v1844_v5 = vpop.f32.mrf.mxu0  ;;  %v148_v9 = vadd.f32 1.0, %v142_v7  ;;  %v5123_v7 = vld [vmem:[#allocation25_spill] sm:$0xff] }
  0xd0   :  { %2124 = vmatpush.bf16.msra.mxu2 %v3944_v10  ;;  %v1857_v6 = vpop.f32.mrf.mxu1 }
  0xd1   :  { %2137 = vmatpush.bf16.msra.mxu3 %v3946_v11  ;;  %v154_v11 = vmul.f32 0.5, %v148_v9  ;;  %v5125_v9 = vld [vmem:[#allocation27_spill] sm:$0xff] }
  0xd2   :  { %2099 = vmatpush.bf16.msra.mxu0 %v3950_v12  ;;  %v1870_v8 = vpop.f32.mrf.mxu2  ;;  %v170_v12 = vld.sshfl [vmem:[#allocation1 + $0x10] sm:$0xff pattern:$0x73625140] }
  0xd3   :  { %2112 = vmatpush.bf16.msra.mxu1 %v3952_v13  ;;  %v1883_v10 = vpop.f32.mrf.mxu3  ;;  %v168_v13 = vld.sshfl [vmem:[#allocation1] sm:$0xff pattern:$0x73625140]  ;;  %167 = vst [vmem:[#allocation1 + $0x20] ss:$4 sm:$0xff] %v154_v11 }
  0xd4   :  { %2125 = vmatpush.bf16.msra.mxu2 %v3956_v14  ;;  %v171_v14 = vld.sshfl [vmem:[#allocation1 + $0x18] sm:$0xff pattern:$0x73625140]  ;;  %v5124_v8 = vld [vmem:[#allocation26_spill] sm:$0xff] }
  0xd5   :  { %2138 = vmatpush.bf16.msra.mxu3 %v3958_v15  ;;  %v169_v15 = vld.sshfl [vmem:[#allocation1 + $0x8] sm:$0xff pattern:$0x73625140]  ;;  %v5126_v10 = vld [vmem:[#allocation28_spill] sm:$0xff]  ;;  %v5127_v11 = vld [vmem:[#allocation29_spill] sm:$0xff] }
  0xd6   :  { %2100 = vmatpush.bf16.msra.mxu0 %v3962_v16  ;;  %v222_v16 = vpack.c.bf16 %v170_v12, %v170_v12  ;;  %v5128_v12 = vld [vmem:[#allocation30_spill] sm:$0xff] }
  0xd7   :  { %2113 = vmatpush.bf16.msra.mxu1 %v3964_v17  ;;  %v220_v17 = vpack.c.bf16 %v168_v13, %v168_v13  ;;  %v5129_v13 = vld [vmem:[#allocation31_spill] sm:$0xff] }
  0xd8   :  { %2126 = vmatpush.bf16.msra.mxu2 %v3968_v18  ;;  %v223_v18 = vpack.c.bf16 %v171_v14, %v171_v14  ;;  %v5130_v14 = vld [vmem:[#allocation32_spill] sm:$0xff] }
  0xd9   :  { %2139 = vmatpush.bf16.msra.mxu3 %v3970_v19  ;;  %v221_v19 = vpack.c.bf16 %v169_v15, %v169_v15  ;;  %v1804_v15 = vadd.f32 %v4454_v61, %v4446_v52  ;;  %v5138_v52 = vld [vmem:[#allocation40_spill] sm:$0xff] }
  0xda   :  { %2101 = vmatpush.bf16.msra.mxu0 %v3977_v21  ;;  %v172_v27 = vld.sshfl [vmem:[#allocation1 + $0x20] sm:$0xff pattern:$0x73625140]  ;;  %v175_v26 = vld.sshfl [vmem:[#allocation1 + $0x38] sm:$0xff pattern:$0x73625140] }
  0xdb   :  { %2114 = vmatpush.bf16.msra.mxu1 %v3979_v22  ;;  %v173_v33 = vld.sshfl [vmem:[#allocation1 + $0x28] sm:$0xff pattern:$0x73625140]  ;;  %v224_v51 = vpack.c.bf16 %v172_v27, %v172_v27  ;;  %v227_v5 = vpack.c.bf16 %v175_v26, %v175_v26  ;;  %v5147_v26 = vld [vmem:[#allocation49_spill] sm:$0xff] }
  0xdc   :  { %2127 = vmatpush.bf16.msra.mxu2 %v3983_v24  ;;  %v5105_v24 = vld [vmem:[#allocation7_spill] sm:$0xff]  ;;  %v225_v6 = vpack.c.bf16 %v173_v33, %v173_v33  ;;  %v5148_v33 = vld [vmem:[#allocation50_spill] sm:$0xff] }
  0xdd   :  { %2140 = vmatpush.bf16.msra.mxu3 %v3985_v25  ;;  %v5106_v25 = vld [vmem:[#allocation8_spill] sm:$0xff] }
  0xde   :  { %2102 = vmatpush.bf16.msra.mxu0 %v3992_v28 }
  0xdf   :  { %2115 = vmatpush.bf16.msra.mxu1 %v3994_v29 }
  0xe0   :  { %2128 = vmatpush.bf16.msra.mxu2 %v4001_v31 }
  0xe1   :  { %2141 = vmatpush.bf16.msra.mxu3 %v4003_v32  ;;  %v5107_v32 = vld [vmem:[#allocation9_spill] sm:$0xff] }
  0xe2   :  { %2103 = vmatpush.bf16.msra.mxu0 %v4007_v36  ;;  %v4572_v21 = vpop.f32.mrf.mxu0  ;;  %v5108_v36 = vld [vmem:[#allocation10_spill] sm:$0xff] }
  0xe3   :  { %2116 = vmatpush.bf16.msra.mxu1 %v4009_v37  ;;  %v4576_v22 = vpop.f32.mrf.mxu1 }
  0xe4   :  { %2129 = vmatpush.bf16.msra.mxu2 %v4013_v38  ;;  %v143_v38 = vld [vmem:[%s4821_s1 + $0x10] sm:$0xff] }
  0xe5   :  { %2142 = vmatpush.bf16.msra.mxu3 %v4015_v39  ;;  %2104 = vmatmul.bf16.vlgmr.msra.gmra.mxu0 %v220_v17  ;;  %v5109_v39 = vld [vmem:[#allocation11_spill] sm:$0xff]  ;;  %v5131_v17 = vld [vmem:[#allocation33_spill] sm:$0xff] }
  0xe6   :  { %2148 = vmatpush.bf16.msrb.mxu0 %v4017_v40  ;;  %2117 = vmatmul.bf16.vlgmr.msra.gmra.mxu1 %v221_v19  ;;  %v5110_v40 = vld [vmem:[#allocation12_spill] sm:$0xff] }
  0xe7   :  { %2161 = vmatpush.bf16.msrb.mxu1 %v4019_v42  ;;  %2130 = vmatmul.bf16.vlgmr.msra.gmra.mxu2 %v222_v16  ;;  %v149_v42 = vadd.f32 1.0, %v143_v38 }
  0xe8   :  { %2174 = vmatpush.bf16.msrb.mxu2 %v4021_v43  ;;  %2143 = vmatmul.bf16.vlgmr.msra.gmra.mxu3 %v223_v18  ;;  %v5132_v18 = vld [vmem:[#allocation34_spill] sm:$0xff] }
  0xe9   :  { %2187 = vmatpush.bf16.msrb.mxu3 %v4023_v44  ;;  %v155_v43 = vmul.f32 0.5, %v149_v42  ;;  %v5111_v44 = vld [vmem:[#allocation13_spill] sm:$0xff] }
  0xea   :  { %2149 = vmatpush.bf16.msrb.mxu0 %v4031_v53  ;;  %v4584_v28 = vpop.f32.mrf.mxu2  ;;  %v1896_v31 = vpop.f32.mrf.mxu0  ;;  %v5112_v53 = vld [vmem:[#allocation14_spill] sm:$0xff]  ;;  %v5139_v42 = vld [vmem:[#allocation41_spill] sm:$0xff] }
  0xeb   :  { %2162 = vmatpush.bf16.msrb.mxu1 %v4033_v54  ;;  %v4586_v29 = vpop.f32.mrf.mxu3  ;;  %v1909_v37 = vpop.f32.mrf.mxu1  ;;  %v5113_v54 = vld [vmem:[#allocation15_spill] sm:$0xff]  ;;  %176 = vst [vmem:[#allocation1] ss:$4 sm:$0xff] %v155_v43  ;;  %v1817_v31 = vadd.f32 %v4474_v30, %v1804_v15  ;;  %v5140_v43 = vld [vmem:[#allocation42_spill] sm:$0xff]  ;;  %v5158_v15 = vld [vmem:[#allocation60_spill] sm:$0xff] }
  0xec   :  { %2175 = vmatpush.bf16.msrb.mxu2 %v4037_v55  ;;  %v5114_v55 = vld [vmem:[#allocation16_spill] sm:$0xff]  ;;  %v5137_v37 = vld [vmem:[#allocation39_spill] sm:$0xff] }
  0xed   :  { %2188 = vmatpush.bf16.msrb.mxu3 %v4039_v56  ;;  %v1830_v38 = vadd.f32 %v4476_v20, %v1817_v31 }
  0xee   :  { %2150 = vmatpush.bf16.msrb.mxu0 %v4043_v57 }
  0xef   :  { %2163 = vmatpush.bf16.msrb.mxu1 %v4045_v58  ;;  %v5115_v58 = vld [vmem:[#allocation17_spill] sm:$0xff] }
  0xf0   :  { %2176 = vmatpush.bf16.msrb.mxu2 %v4049_v59  ;;  %v5116_v59 = vld [vmem:[#allocation18_spill] sm:$0xff] }
  0xf1   :  { %2189 = vmatpush.bf16.msrb.mxu3 %v4051_v60  ;;  %v5117_v60 = vld [vmem:[#allocation19_spill] sm:$0xff] }
  0xf2   :  { %2151 = vmatpush.bf16.msrb.mxu0 %v4058_v62  ;;  %v1922_v56 = vpop.f32.mrf.mxu2  ;;  %v5118_v62 = vld [vmem:[#allocation20_spill] sm:$0xff] }
  0xf3   :  { %2164 = vmatpush.bf16.msrb.mxu1 %v4060_v63  ;;  %v1935_v57 = vpop.f32.mrf.mxu3  ;;  %v174_v63 = vld.sshfl [vmem:[#allocation1 + $0x30] sm:$0xff pattern:$0x73625140]  ;;  %v1843_v56 = vadd.f32 %v4529_v1, %v1830_v38 }
  0xf4   :  { %2177 = vmatpush.bf16.msrb.mxu2 %v5105_v24  ;;  %v226_v35 = vpack.c.bf16 %v174_v63, %v174_v63  ;;  %v5133_v24 = vld [vmem:[#allocation35_spill] sm:$0xff]  ;;  %v5143_v57 = vld [vmem:[#allocation45_spill] sm:$0xff]  ;;  %v5150_v1 = vld [vmem:[#allocation52_spill] sm:$0xff] }
  0xf5   :  { %2190 = vmatpush.bf16.msrb.mxu3 %v5106_v25  ;;  %v5134_v25 = vld [vmem:[#allocation36_spill] sm:$0xff]  ;;  %v1856_v63 = vadd.f32 %v4533_v2, %v1843_v56  ;;  %v5165_v38 = vld [vmem:[#allocation67_spill] sm:$0xff] }
  0xf6   :  { %2152 = vmatpush.bf16.msrb.mxu0 %v5107_v32  ;;  %v5135_v32 = vld [vmem:[#allocation37_spill] sm:$0xff] }
  0xf7   :  { %2165 = vmatpush.bf16.msrb.mxu1 %v5108_v36  ;;  %v5136_v36 = vld [vmem:[#allocation38_spill] sm:$0xff] }
  0xf8   :  { %2178 = vmatpush.bf16.msrb.mxu2 %v5109_v39 }
  0xf9   :  { %2191 = vmatpush.bf16.msrb.mxu3 %v5110_v40 }
  0xfa   :  { %2153 = vmatpush.bf16.msrb.mxu0 %v5111_v44  ;;  %v144_v44 = vld [vmem:[%s4821_s1 + $0x18] sm:$0xff] }
  0xfb   :  { %2166 = vmatpush.bf16.msrb.mxu1 %v5112_v53  ;;  %v5141_v53 = vld [vmem:[#allocation43_spill] sm:$0xff] }
  0xfc   :  { %2179 = vmatpush.bf16.msrb.mxu2 %v5113_v54  ;;  %v5142_v54 = vld [vmem:[#allocation44_spill] sm:$0xff] }
  0xfd   :  { %2192 = vmatpush.bf16.msrb.mxu3 %v5114_v55  ;;  %v150_v55 = vadd.f32 1.0, %v144_v44  ;;  %v5169_v44 = vld [vmem:[#allocation71_spill] sm:$0xff] }
  0xfe   :  { %2154 = vmatpush.bf16.msrb.mxu0 %v5115_v58  ;;  %v5144_v58 = vld [vmem:[#allocation46_spill] sm:$0xff] }
  0xff   :  { %2167 = vmatpush.bf16.msrb.mxu1 %v5116_v59  ;;  %v156_v20 = vmul.f32 0.5, %v150_v55  ;;  %v5145_v59 = vld [vmem:[#allocation47_spill] sm:$0xff] }
 0x100   :  { %2180 = vmatpush.bf16.msrb.mxu2 %v5117_v60  ;;  %v5146_v60 = vld [vmem:[#allocation48_spill] sm:$0xff] }
 0x101   :  { %2193 = vmatpush.bf16.msrb.mxu3 %v5118_v62  ;;  %177 = vst [vmem:[#allocation1 + $0x20] ss:$4 sm:$0xff] %v156_v20  ;;  %v5171_v20 = vld [vmem:[#allocation73_spill] sm:$0xff] }
 0x102   :  { %2155 = vmatpush.bf16.msrb.mxu0 %v5119_v46  ;;  %v4617_v16 = vpop.f32.mrf.mxu0  ;;  %v5149_v46 = vld [vmem:[#allocation51_spill] sm:$0xff] }
 0x103   :  { %2168 = vmatpush.bf16.msrb.mxu1 %v5120_v34  ;;  %v4621_v19 = vpop.f32.mrf.mxu1  ;;  %v178_v34 = vld.sshfl [vmem:[#allocation1] sm:$0xff pattern:$0x73625140] }
 0x104   :  { %2181 = vmatpush.bf16.msrb.mxu2 %v5121_v50  ;;  %v179_v50 = vld.sshfl [vmem:[#allocation1 + $0x8] sm:$0xff pattern:$0x73625140]  ;;  %v228_v2 = vpack.c.bf16 %v178_v34, %v178_v34 }
 0x105   :  { %2194 = vmatpush.bf16.msrb.mxu3 %v5122_v0  ;;  %2156 = vmatmul.bf16.vlgmr.msrb.gmra.mxu0 %v224_v51  ;;  %v1869_v51 = vadd.f32 %v4541_v3, %v1856_v63  ;;  %v181_v0 = vld.sshfl [vmem:[#allocation1 + $0x18] sm:$0xff pattern:$0x73625140]  ;;  %v5157_v3 = vld [vmem:[#allocation59_spill] sm:$0xff] }
 0x106   :  { %2200 = vmatpush.bf16.msra.mxu0 %v5123_v7  ;;  %2169 = vmatmul.bf16.vlgmr.msrb.gmra.mxu1 %v225_v6  ;;  %v5152_v6 = vld [vmem:[#allocation54_spill] sm:$0xff] }
 0x107   :  { %2213 = vmatpush.bf16.msra.mxu1 %v5124_v8  ;;  %2182 = vmatmul.bf16.vlgmr.msrb.gmra.mxu2 %v226_v35  ;;  %v180_v35 = vld.sshfl [vmem:[#allocation1 + $0x10] sm:$0xff pattern:$0x73625140] }
 0x108   :  { %2226 = vmatpush.bf16.msra.mxu2 %v5125_v9  ;;  %2195 = vmatmul.bf16.vlgmr.msrb.gmra.mxu3 %v227_v5  ;;  %v5151_v5 = vld [vmem:[#allocation53_spill] sm:$0xff]  ;;  %v230_v7 = vpack.c.bf16 %v180_v35, %v180_v35  ;;  %v5153_v8 = vld [vmem:[#allocation55_spill] sm:$0xff]  ;;  %v5154_v9 = vld [vmem:[#allocation56_spill] sm:$0xff] }
 0x109   :  { %2239 = vmatpush.bf16.msra.mxu3 %v5126_v10  ;;  %v229_v10 = vpack.c.bf16 %v179_v50, %v179_v50  ;;  %v5179_v50 = vld [vmem:[#allocation81_spill] sm:$0xff] }
 0x10a   :  { %2201 = vmatpush.bf16.msra.mxu0 %v5127_v11  ;;  %v4630_v61 = vpop.f32.mrf.mxu2  ;;  %v1948_v40 = vpop.f32.mrf.mxu0  ;;  %v231_v11 = vpack.c.bf16 %v181_v0, %v181_v0  ;;  %v5180_v0 = vld [vmem:[#allocation82_spill] sm:$0xff] }
 0x10b   :  { %2214 = vmatpush.bf16.msra.mxu1 %v5128_v12  ;;  %v4633_v39 = vpop.f32.mrf.mxu3  ;;  %v1961_v30 = vpop.f32.mrf.mxu1  ;;  %v1882_v12 = vadd.f32 %v4543_v4, %v1869_v51  ;;  %v5162_v4 = vld [vmem:[#allocation64_spill] sm:$0xff] }
 0x10c   :  { %2227 = vmatpush.bf16.msra.mxu2 %v5129_v13  ;;  %v5155_v13 = vld [vmem:[#allocation57_spill] sm:$0xff]  ;;  %v5166_v40 = vld [vmem:[#allocation68_spill] sm:$0xff]  ;;  %v5168_v30 = vld [vmem:[#allocation70_spill] sm:$0xff] }
 0x10d   :  { %2240 = vmatpush.bf16.msra.mxu3 %v5130_v14  ;;  %v5156_v14 = vld [vmem:[#allocation58_spill] sm:$0xff] }
 0x10e   :  { %2202 = vmatpush.bf16.msra.mxu0 %v5131_v17  ;;  %v1895_v17 = vadd.f32 %v4572_v21, %v1882_v12  ;;  %v5164_v21 = vld [vmem:[#allocation66_spill] sm:$0xff] }
 0x10f   :  { %2215 = vmatpush.bf16.msra.mxu1 %v5132_v18  ;;  %v5159_v18 = vld [vmem:[#allocation61_spill] sm:$0xff] }
 0x110   :  { %2228 = vmatpush.bf16.msra.mxu2 %v5133_v24  ;;  %v5160_v24 = vld [vmem:[#allocation62_spill] sm:$0xff]  ;;  %v1908_v31 = vadd.f32 %v4576_v22, %v1895_v17  ;;  %v5170_v22 = vld [vmem:[#allocation72_spill] sm:$0xff]  ;;  %v5187_v17 = vld [vmem:[#allocation89_spill] sm:$0xff] }
 0x111   :  { %2241 = vmatpush.bf16.msra.mxu3 %v5134_v25  ;;  %v5161_v25 = vld [vmem:[#allocation63_spill] sm:$0xff] }
 0x112   :  { %2203 = vmatpush.bf16.msra.mxu0 %v5135_v32  ;;  %v1974_v62 = vpop.f32.mrf.mxu2 }
 0x113   :  { %2216 = vmatpush.bf16.msra.mxu1 %v5136_v36  ;;  %v1987_v27 = vpop.f32.mrf.mxu3  ;;  %v1921_v36 = vadd.f32 %v4584_v28, %v1908_v31  ;;  %v5191_v31 = vld [vmem:[#allocation93_spill] sm:$0xff] }
 0x114   :  { %2229 = vmatpush.bf16.msra.mxu2 %v5137_v37  ;;  %v5163_v37 = vld [vmem:[#allocation65_spill] sm:$0xff] }
 0x115   :  { %2242 = vmatpush.bf16.msra.mxu3 %v5138_v52 }
 0x116   :  { %2204 = vmatpush.bf16.msra.mxu0 %v5139_v42  ;;  %v1934_v42 = vadd.f32 %v4586_v29, %v1921_v36  ;;  %v5193_v36 = vld [vmem:[#allocation95_spill] sm:$0xff] }
 0x117   :  { %2217 = vmatpush.bf16.msra.mxu1 %v5140_v43  ;;  %v5167_v43 = vld [vmem:[#allocation69_spill] sm:$0xff] }
 0x118   :  { %2230 = vmatpush.bf16.msra.mxu2 %v5141_v53  ;;  %v3884_v53 = vmov 0.0  }
 0x119   :  { %2243 = vmatpush.bf16.msra.mxu3 %v5142_v54  ;;  %36 = vst [vmem:[#allocation2] sm:$0x3] %v3884_v53  ;;  %v1947_v54 = vadd.f32 %v4617_v16, %v1934_v42 }
 0x11a   :  { %2205 = vmatpush.bf16.msra.mxu0 %v5143_v57  ;;  %37 = vst [vmem:[#allocation3] sm:$0x3] %v3884_v53  ;;  %v5172_v57 = vld [vmem:[#allocation74_spill] sm:$0xff] }
 0x11b   :  { %2218 = vmatpush.bf16.msra.mxu1 %v5144_v58  ;;  %v145_v58 = vld [vmem:[%s4821_s1 + $0x20] sm:$0xff]  ;;  %v1960_v63 = vadd.f32 %v4621_v19, %v1947_v54  ;;  %v5181_v19 = vld [vmem:[#allocation83_spill] sm:$0xff] }
 0x11c   :  { %2231 = vmatpush.bf16.msra.mxu2 %v5145_v59  ;;  %v5173_v59 = vld [vmem:[#allocation75_spill] sm:$0xff]  ;;  %v151_v62 = vadd.f32 1.0, %v145_v58 }
 0x11d   :  { %2244 = vmatpush.bf16.msra.mxu3 %v5146_v60  ;;  %v5174_v60 = vld [vmem:[#allocation76_spill] sm:$0xff]  ;;  %v1973_v27 = vadd.f32 %v4630_v61, %v1960_v63  ;;  %v5201_v54 = vld [vmem:[#allocation103_spill] sm:$0xff]  ;;  %v5204_v63 = vld [vmem:[#allocation106_spill] sm:$0xff] }
 0x11e   :  { %2206 = vmatpush.bf16.msra.mxu0 %v5147_v26  ;;  %v157_v16 = vmul.f32 0.5, %v151_v62  ;;  %v5175_v26 = vld [vmem:[#allocation77_spill] sm:$0xff]  ;;  %v5182_v61 = vld [vmem:[#allocation84_spill] sm:$0xff] }
 0x11f   :  { %2219 = vmatpush.bf16.msra.mxu1 %v5148_v33  ;;  %v5176_v33 = vld [vmem:[#allocation78_spill] sm:$0xff]  ;;  %v1986_v51 = vadd.f32 %v4633_v39, %v1973_v27  ;;  %v5185_v39 = vld [vmem:[#allocation87_spill] sm:$0xff]  ;;  %v5203_v62 = vld [vmem:[#allocation105_spill] sm:$0xff] }
 0x120   :  { %2232 = vmatpush.bf16.msra.mxu2 %v5149_v46  ;;  %v5177_v46 = vld [vmem:[#allocation79_spill] sm:$0xff]  ;;  %186 = vst [vmem:[#allocation1] ss:$4 sm:$0xff] %v157_v16  ;;  %v628_v58 = vld [vmem:[#allocation2] sm:$0x3] }
 0x121   :  { %2245 = vmatpush.bf16.msra.mxu3 %v5150_v1  ;;  %v5178_v1 = vld [vmem:[#allocation80_spill] sm:$0xff] }
 0x122   :  { %2207 = vmatpush.bf16.msra.mxu0 %v5151_v5  ;;  %v1998_v32 = vpop.f32.mrf.mxu0  ;;  %v182_v5 = vld.sshfl [vmem:[#allocation1 + $0x20] sm:$0xff pattern:$0x73625140] }
 0x123   :  { %2220 = vmatpush.bf16.msra.mxu1 %v5152_v6  ;;  %v2011_v52 = vpop.f32.mrf.mxu1  ;;  %v184_v6 = vld.sshfl [vmem:[#allocation1 + $0x30] sm:$0xff pattern:$0x73625140] }
 0x124   :  { %2233 = vmatpush.bf16.msra.mxu2 %v5153_v8  ;;  %v185_v8 = vld.sshfl [vmem:[#allocation1 + $0x38] sm:$0xff pattern:$0x73625140]  ;;  %v234_v12 = vpack.c.bf16 %v184_v6, %v184_v6 }
 0x125   :  { %2246 = vmatpush.bf16.msra.mxu3 %v5154_v9  ;;  %2208 = vmatmul.bf16.vlgmr.msra.gmra.mxu0 %v228_v2  ;;  %v1999_v2 = vadd.f32 %v1998_v32, %v1986_v51  ;;  %v5183_v9 = vld [vmem:[#allocation85_spill] sm:$0xff]  ;;  %v5192_v32 = vld [vmem:[#allocation94_spill] sm:$0xff] }
 0x126   :  { %2252 = vmatpush.bf16.msrb.mxu0 %v5155_v13  ;;  %2221 = vmatmul.bf16.vlgmr.msra.gmra.mxu1 %v229_v10  ;;  %v5184_v10 = vld [vmem:[#allocation86_spill] sm:$0xff]  ;;  %v5186_v13 = vld [vmem:[#allocation88_spill] sm:$0xff]  ;;  %v5207_v51 = vld [vmem:[#allocation109_spill] sm:$0xff] }
 0x127   :  { %2265 = vmatpush.bf16.msrb.mxu1 %v5156_v14  ;;  %2234 = vmatmul.bf16.vlgmr.msra.gmra.mxu2 %v230_v7  ;;  %v183_v7 = vld.sshfl [vmem:[#allocation1 + $0x28] sm:$0xff pattern:$0x73625140] }
 0x128   :  { %2278 = vmatpush.bf16.msrb.mxu2 %v5157_v3  ;;  %2247 = vmatmul.bf16.vlgmr.msra.gmra.mxu3 %v231_v11  ;;  %v232_v11 = vpack.c.bf16 %v182_v5, %v182_v5  ;;  %v233_v14 = vpack.c.bf16 %v183_v7, %v183_v7  ;;  %v235_v3 = vpack.c.bf16 %v185_v8, %v185_v8  ;;  %v5212_v7 = vld [vmem:[#allocation114_spill] sm:$0xff] }
 0x129   :  { %2291 = vmatpush.bf16.msrb.mxu3 %v5158_v15  ;;  %v2012_v15 = vadd.f32 %v2011_v52, %v1999_v2  ;;  %v5211_v2 = vld [vmem:[#allocation113_spill] sm:$0xff] }
 0x12a   :  { %2253 = vmatpush.bf16.msrb.mxu0 %v5159_v18  ;;  %v2024_v28 = vpop.f32.mrf.mxu2  ;;  %v2000_v56 = vpop.f32.mrf.mxu0  ;;  %v5188_v18 = vld [vmem:[#allocation90_spill] sm:$0xff] }
 0x12b   :  { %2266 = vmatpush.bf16.msrb.mxu1 %v5160_v24  ;;  %v2037_v55 = vpop.f32.mrf.mxu3  ;;  %v2013_v29 = vpop.f32.mrf.mxu1  ;;  %v5189_v24 = vld [vmem:[#allocation91_spill] sm:$0xff]  ;;  %v5202_v56 = vld [vmem:[#allocation104_spill] sm:$0xff]  ;;  %v188_v8 = vld.sshfl [vmem:[#allocation1] sm:$0xff pattern:$0x73625140] }
 0x12c   :  { %2279 = vmatpush.bf16.msrb.mxu2 %v5161_v25  ;;  %v5190_v25 = vld [vmem:[#allocation92_spill] sm:$0xff] }
 0x12d   :  { %2292 = vmatpush.bf16.msrb.mxu3 %v5162_v4  ;;  %v2025_v4 = vadd.f32 %v2024_v28, %v2012_v15  ;;  %v5200_v28 = vld [vmem:[#allocation102_spill] sm:$0xff] }
 0x12e   :  { %2254 = vmatpush.bf16.msrb.mxu0 %v5163_v37  ;;  %v5194_v37 = vld [vmem:[#allocation96_spill] sm:$0xff]  ;;  %v5216_v15 = vld [vmem:[#allocation118_spill] sm:$0xff] }
 0x12f   :  { %2267 = vmatpush.bf16.msrb.mxu1 %v5164_v21  ;;  %v2038_v21 = vadd.f32 %v2037_v55, %v2025_v4  ;;  %v5218_v4 = vld [vmem:[#allocation120_spill] sm:$0xff] }
 0x130   :  { %2280 = vmatpush.bf16.msrb.mxu2 %v5165_v38  ;;  %v5195_v38 = vld [vmem:[#allocation97_spill] sm:$0xff] }
 0x131   :  { %2293 = vmatpush.bf16.msrb.mxu3 %v5166_v40  ;;  %v5196_v40 = vld [vmem:[#allocation98_spill] sm:$0xff] }
 0x132   :  { %2255 = vmatpush.bf16.msrb.mxu0 %v5167_v43  ;;  %v2026_v34 = vpop.f32.mrf.mxu2 }
 0x133   :  { %2268 = vmatpush.bf16.msrb.mxu1 %v5168_v30  ;;  %v2039_v35 = vpop.f32.mrf.mxu3  ;;  %v5197_v30 = vld [vmem:[#allocation99_spill] sm:$0xff] }
 0x134   :  { %2281 = vmatpush.bf16.msrb.mxu2 %v5169_v44  ;;  %v5198_v44 = vld [vmem:[#allocation100_spill] sm:$0xff] }
 0x135   :  { %2294 = vmatpush.bf16.msrb.mxu3 %v5170_v22  ;;  %v5199_v22 = vld [vmem:[#allocation101_spill] sm:$0xff] }
 0x136   :  { %2256 = vmatpush.bf16.msrb.mxu0 %v5171_v20  ;;  %v3885_v20 = vmov 2.0  }
 0x137   :  { %2269 = vmatpush.bf16.msrb.mxu1 %v5172_v57  ;;  %3849 = vrcp.f32 %v3885_v20  ;;  %v5227_v20 = vld [vmem:[#allocation129_spill] sm:$0xff] }
 0x138   :  { %2282 = vmatpush.bf16.msrb.mxu2 %v5173_v59 }
 0x139   :  { %2295 = vmatpush.bf16.msrb.mxu3 %v5174_v60  ;;  %v146_v60 = vld [vmem:[%s4821_s1 + $0x28] sm:$0xff] }
 0x13a   :  { %2257 = vmatpush.bf16.msrb.mxu0 %v5175_v26  ;;  %v152_v26 = vadd.f32 1.0, %v146_v60  ;;  %v5230_v60 = vld [vmem:[#allocation132_spill] sm:$0xff] }
 0x13b   :  { %2270 = vmatpush.bf16.msrb.mxu1 %v5176_v33  ;;  %v5205_v33 = vld [vmem:[#allocation107_spill] sm:$0xff] }
 0x13c   :  { %2283 = vmatpush.bf16.msrb.mxu2 %v5177_v46  ;;  %v5206_v46 = vld [vmem:[#allocation108_spill] sm:$0xff]  ;;  %v158_v34 = vmul.f32 0.5, %v152_v26  ;;  %v5232_v26 = vld [vmem:[#allocation134_spill] sm:$0xff] }
 0x13d   :  { %2296 = vmatpush.bf16.msrb.mxu3 %v5178_v1  ;;  %v3850_v35 = vpop.eup %3849 }
 0x13e   :  { %2258 = vmatpush.bf16.msrb.mxu0 %v5179_v50  ;;  %v5208_v50 = vld [vmem:[#allocation110_spill] sm:$0xff]  ;;  %187 = vst [vmem:[#allocation1 + $0x20] ss:$4 sm:$0xff] %v158_v34  ;;  %v2424_v6 = vmul.f32 2.0, %v3850_v35  ;;  %vm2428_vm1 = vweird.f32 %v3850_v35 }
 0x13f   :  { %2271 = vmatpush.bf16.msrb.mxu1 %v5180_v0  ;;  %v5209_v0 = vld [vmem:[#allocation111_spill] sm:$0xff] }
 0x140   :  { %2284 = vmatpush.bf16.msrb.mxu2 %v5181_v19  ;;  %v5210_v19 = vld [vmem:[#allocation112_spill] sm:$0xff] }
 0x141   :  { %2297 = vmatpush.bf16.msrb.mxu3 %v5182_v61 }
 0x142   :  { %2259 = vmatpush.bf16.msrb.mxu0 %v5183_v9  ;;  %v2050_v52 = vpop.f32.mrf.mxu0  ;;  %v190_v9 = vld.sshfl [vmem:[#allocation1 + $0x10] sm:$0xff pattern:$0x73625140] }
 0x143   :  { %2272 = vmatpush.bf16.msrb.mxu1 %v5184_v10  ;;  %v2051_v42 = vadd.f32 %v2050_v52, %v2038_v21  ;;  %v2063_v43 = vpop.f32.mrf.mxu1  ;;  %v5213_v10 = vld [vmem:[#allocation115_spill] sm:$0xff]  ;;  %v5220_v21 = vld [vmem:[#allocation122_spill] sm:$0xff] }
 0x144   :  { %2285 = vmatpush.bf16.msrb.mxu2 %v5185_v39  ;;  %v191_v39 = vld.sshfl [vmem:[#allocation1 + $0x18] sm:$0xff pattern:$0x73625140] }
 0x145   :  { %2298 = vmatpush.bf16.msrb.mxu3 %v5186_v13  ;;  %2260 = vmatmul.bf16.vlgmr.msrb.gmra.mxu0 %v232_v11  ;;  %v2064_v53 = vadd.f32 %v2063_v43, %v2051_v42  ;;  %v5214_v11 = vld [vmem:[#allocation116_spill] sm:$0xff]  ;;  %v2425_v13 = vsub.f32 1.0, %v2424_v6  ;;  %v5237_v6 = vld [vmem:[#allocation139_spill] sm:$0xff] }
 0x146   :  { %2304 = vmatpush.bf16.msra.mxu0 %v5187_v17  ;;  %2273 = vmatmul.bf16.vlgmr.msrb.gmra.mxu1 %v233_v14  ;;  %v236_v17 = vpack.c.bf16 %v188_v8, %v188_v8  ;;  %v5240_v8 = vld [vmem:[#allocation142_spill] sm:$0xff] }
 0x147   :  { %2317 = vmatpush.bf16.msra.mxu1 %v5188_v18  ;;  %2286 = vmatmul.bf16.vlgmr.msrb.gmra.mxu2 %v234_v12  ;;  %v189_v12 = vld.sshfl [vmem:[#allocation1 + $0x8] sm:$0xff pattern:$0x73625140]  ;;  %v238_v18 = vpack.c.bf16 %v190_v9, %v190_v9  ;;  %v2426_v52 = vmul.f32 %v3850_v35, %v2425_v13 }
 0x148   :  { %2330 = vmatpush.bf16.msra.mxu2 %v5189_v24  ;;  %2299 = vmatmul.bf16.vlgmr.msrb.gmra.mxu3 %v235_v3  ;;  %v5215_v3 = vld [vmem:[#allocation117_spill] sm:$0xff]  ;;  %v5241_v9 = vld [vmem:[#allocation143_spill] sm:$0xff]  ;;  %v5244_v13 = vld [vmem:[#allocation146_spill] sm:$0xff] }
 0x149   :  { %2343 = vmatpush.bf16.msra.mxu3 %v5190_v25  ;;  %v5217_v25 = vld [vmem:[#allocation119_spill] sm:$0xff] }
 0x14a   :  { %2305 = vmatpush.bf16.msra.mxu0 %v5191_v31  ;;  %v2076_v55 = vpop.f32.mrf.mxu2  ;;  %v2052_v59 = vpop.f32.mrf.mxu0  ;;  %v237_v31 = vpack.c.bf16 %v189_v12, %v189_v12 }
 0x14b   :  { %2318 = vmatpush.bf16.msra.mxu1 %v5192_v32  ;;  %v2077_v57 = vadd.f32 %v2076_v55, %v2064_v53  ;;  %v2089_v29 = vpop.f32.mrf.mxu3  ;;  %v2065_v27 = vpop.f32.mrf.mxu1  ;;  %v239_v32 = vpack.c.bf16 %v191_v39, %v191_v39  ;;  %v5226_v53 = vld [vmem:[#allocation128_spill] sm:$0xff]  ;;  %v5229_v59 = vld [vmem:[#allocation131_spill] sm:$0xff]  ;;  %v5243_v39 = vld [vmem:[#allocation145_spill] sm:$0xff] }
 0x14c   :  { %2331 = vmatpush.bf16.msra.mxu2 %v5193_v36  ;;  %v5231_v27 = vld [vmem:[#allocation133_spill] sm:$0xff] }
 0x14d   :  { %2344 = vmatpush.bf16.msra.mxu3 %v5194_v37  ;;  %v2090_v16 = vadd.f32 %v2089_v29, %v2077_v57  ;;  %v5219_v37 = vld [vmem:[#allocation121_spill] sm:$0xff]  ;;  %v5228_v57 = vld [vmem:[#allocation130_spill] sm:$0xff] }
 0x14e   :  { %2306 = vmatpush.bf16.msra.mxu0 %v5195_v38  ;;  %v5221_v38 = vld [vmem:[#allocation123_spill] sm:$0xff] }
 0x14f   :  { %2319 = vmatpush.bf16.msra.mxu1 %v5196_v40  ;;  %v2093_v1 = vadd.f32 %v2090_v16, %v628_v58  ;;  %v5222_v40 = vld [vmem:[#allocation124_spill] sm:$0xff] }
 0x150   :  { %2332 = vmatpush.bf16.msra.mxu2 %v5197_v30  ;;  %v5223_v30 = vld [vmem:[#allocation125_spill] sm:$0xff] }
 0x151   :  { %2345 = vmatpush.bf16.msra.mxu3 %v5198_v44  ;;  %2094 = vst [vmem:[#allocation2] sm:$0x3] %v2093_v1  ;;  %v5224_v44 = vld [vmem:[#allocation126_spill] sm:$0xff] }
 0x152   :  { %2307 = vmatpush.bf16.msra.mxu0 %v5199_v22  ;;  %v2078_v61 = vpop.f32.mrf.mxu2  ;;  %v2427_v22 = vadd.f32 %v3850_v35, %v2426_v52 }
 0x153   :  { %2320 = vmatpush.bf16.msra.mxu1 %v5200_v28  ;;  %v2091_v5 = vpop.f32.mrf.mxu3  ;;  %v5225_v28 = vld [vmem:[#allocation127_spill] sm:$0xff] }
 0x154   :  { %2333 = vmatpush.bf16.msra.mxu2 %v5201_v54  ;;  %v4747_v29 = vsel %vm2428_vm1, %v3850_v35, %v2427_v22 }
 0x155   :  { %2346 = vmatpush.bf16.msra.mxu3 %v5202_v56 }
 0x156   :  { %2308 = vmatpush.bf16.msra.mxu0 %v5203_v62 }
 0x157   :  { %2321 = vmatpush.bf16.msra.mxu1 %v5204_v63 }
 0x158   :  { %2334 = vmatpush.bf16.msra.mxu2 %v5205_v33  ;;  %v2413_v14 = vld [vmem:[#allocation2] sm:$0x3]  ;;  %v5233_v33 = vld [vmem:[#allocation135_spill] sm:$0xff] }
 0x159   :  { %2347 = vmatpush.bf16.msra.mxu3 %v5206_v46  ;;  %v2416_v24 = vsel %vm2415_vm0, %v2413_v14, 0.0  ;;  %v5234_v46 = vld [vmem:[#allocation136_spill] sm:$0xff] }
 0x15a   :  { %2309 = vmatpush.bf16.msra.mxu0 %v5207_v51  ;;  %v2417_v36 = vrot.slane %v2416_v24, 4 }
 0x15b   :  { %2322 = vmatpush.bf16.msra.mxu1 %v5208_v50 }
 0x15c   :  { %2335 = vmatpush.bf16.msra.mxu2 %v5209_v0  ;;  %v2418_v42 = vadd.f32 %v2417_v36, %v2416_v24  ;;  %v5235_v0 = vld [vmem:[#allocation137_spill] sm:$0xff] }
 0x15d   :  { %2348 = vmatpush.bf16.msra.mxu3 %v5210_v19  ;;  %v5236_v19 = vld [vmem:[#allocation138_spill] sm:$0xff] }
 0x15e   :  { %2310 = vmatpush.bf16.msra.mxu0 %v5211_v2  ;;  %v2419_v43 = vrot.slane %v2418_v42, 2  ;;  %v5238_v2 = vld [vmem:[#allocation140_spill] sm:$0xff] }
 0x15f   :  { %2323 = vmatpush.bf16.msra.mxu1 %v5212_v7  ;;  %v5239_v7 = vld [vmem:[#allocation141_spill] sm:$0xff] }
 0x160   :  { %2336 = vmatpush.bf16.msra.mxu2 %v5213_v10  ;;  %v2420_v54 = vadd.f32 %v2419_v43, %v2418_v42  ;;  %v5242_v10 = vld [vmem:[#allocation144_spill] sm:$0xff] }
 0x161   :  { %2349 = vmatpush.bf16.msra.mxu3 %v5214_v11 }
 0x162   :  { %2311 = vmatpush.bf16.msra.mxu0 %v5215_v3  ;;  %v2421_v56 = vrot.slane %v2420_v54, 1  ;;  %v2105_v55 = vpop.f32.mrf.mxu0  ;;  %v193_v3 = vld.sshfl [vmem:[#allocation1 + $0x28] sm:$0xff pattern:$0x73625140] }
 0x163   :  { %2324 = vmatpush.bf16.msra.mxu1 %v5216_v15  ;;  %v2118_v58 = vpop.f32.mrf.mxu1  ;;  %v194_v15 = vld.sshfl [vmem:[#allocation1 + $0x30] sm:$0xff pattern:$0x73625140]  ;;  %v241_v24 = vpack.c.bf16 %v193_v3, %v193_v3 }
 0x164   :  { %2337 = vmatpush.bf16.msra.mxu2 %v5217_v25  ;;  %v2422_v62 = vadd.f32 %v2421_v56, %v2420_v54  ;;  %v2119_v63 = vadd.f32 %v2118_v58, %v2105_v55  ;;  %v242_v25 = vpack.c.bf16 %v194_v15, %v194_v15 }
 0x165   :  { %2350 = vmatpush.bf16.msra.mxu3 %v5218_v4  ;;  %2312 = vmatmul.bf16.vlgmr.msra.gmra.mxu0 %v236_v17  ;;  %v195_v17 = vld.sshfl [vmem:[#allocation1 + $0x38] sm:$0xff pattern:$0x73625140] }
 0x166   :  { %2356 = vmatpush.bf16.msrb.mxu0 %v5219_v37  ;;  %2325 = vmatmul.bf16.vlgmr.msra.gmra.mxu1 %v237_v31  ;;  %v4752_v16 = vmul.f32 %v4747_v29, %v2422_v62  ;;  %v243_v4 = vpack.c.bf16 %v195_v17, %v195_v17  ;;  %v2095_v17 = vld [vmem:[#allocation3] sm:$0x3] }
 0x167   :  { %2369 = vmatpush.bf16.msrb.mxu1 %v5220_v21  ;;  %2338 = vmatmul.bf16.vlgmr.msra.gmra.mxu2 %v238_v18 }
 0x168   :  { %2382 = vmatpush.bf16.msrb.mxu2 %v5221_v38  ;;  %2351 = vmatmul.bf16.vlgmr.msra.gmra.mxu3 %v239_v32  ;;  %v2461_v1 = vsub.f32 %v2413_v14, %v4752_v16  ;;  %v192_v14 = vld.sshfl [vmem:[#allocation1 + $0x20] sm:$0xff pattern:$0x73625140] }
 0x169   :  { %2395 = vmatpush.bf16.msrb.mxu3 %v5222_v40  ;;  %v240_v18 = vpack.c.bf16 %v192_v14, %v192_v14 }
 0x16a   :  { %2357 = vmatpush.bf16.msrb.mxu0 %v5223_v30  ;;  %v2131_v34 = vpop.f32.mrf.mxu2  ;;  %2463 = vxpose.xlu0.b32.start.end [1/1] (short) %v2461_v1, 128  ;;  %v2107_v50 = vpop.f32.mrf.mxu0 }
 0x16b   :  { %2370 = vmatpush.bf16.msrb.mxu1 %v5224_v44  ;;  %v2132_v35 = vadd.f32 %v2131_v34, %v2119_v63  ;;  %v2144_v51 = vpop.f32.mrf.mxu3  ;;  %v2120_v5 = vpop.f32.mrf.mxu1 }
 0x16c   :  { %2383 = vmatpush.bf16.msrb.mxu2 %v5225_v28 }
 0x16d   :  { %2396 = vmatpush.bf16.msrb.mxu3 %v5226_v53  ;;  %v2145_v61 = vadd.f32 %v2144_v51, %v2132_v35 }
 0x16e   :  { %2358 = vmatpush.bf16.msrb.mxu0 %v5227_v20 }
 0x16f   :  { %2371 = vmatpush.bf16.msrb.mxu1 %v5228_v57 }
 0x170   :  { %2384 = vmatpush.bf16.msrb.mxu2 %v5229_v59 }
 0x171   :  { %2397 = vmatpush.bf16.msrb.mxu3 %v5230_v60 }
 0x172   :  { %2359 = vmatpush.bf16.msrb.mxu0 %v5231_v27  ;;  %v2133_v11 = vpop.f32.mrf.mxu2 }
 0x173   :  { %2372 = vmatpush.bf16.msrb.mxu1 %v5232_v26  ;;  %v2146_v12 = vpop.f32.mrf.mxu3 }
 0x174   :  { %2385 = vmatpush.bf16.msrb.mxu2 %v5233_v33 }
 0x175   :  { %2398 = vmatpush.bf16.msrb.mxu3 %v5234_v46 }
 0x176   :  { %2360 = vmatpush.bf16.msrb.mxu0 %v5235_v0 }
 0x177   :  { %2373 = vmatpush.bf16.msrb.mxu1 %v5236_v19 }
 0x178   :  { %2386 = vmatpush.bf16.msrb.mxu2 %v5237_v6 }
 0x179   :  { %2399 = vmatpush.bf16.msrb.mxu3 %v5238_v2 }
 0x17a   :  { %2361 = vmatpush.bf16.msrb.mxu0 %v5239_v7 }
 0x17b   :  { %2374 = vmatpush.bf16.msrb.mxu1 %v5240_v8 }
 0x17c   :  { %2387 = vmatpush.bf16.msrb.mxu2 %v5241_v9 }
 0x17d   :  { %2400 = vmatpush.bf16.msrb.mxu3 %v5242_v10 }
 0x17e   :  { %2362 = vmatpush.bf16.msrb.mxu0 %v5243_v39 }
 0x17f   :  { %2375 = vmatpush.bf16.msrb.mxu1 %v5244_v13 }
 0x180   :  { %2388 = vmatpush.bf16.msrb.mxu2 %v4498_v41 }
 0x181   :  { %2401 = vmatpush.bf16.msrb.mxu3 %v4500_v48 }
 0x182   :  { %2363 = vmatpush.bf16.msrb.mxu0 %v4502_v47  ;;  %v2157_v48 = vpop.f32.mrf.mxu0 }
 0x183   :  { %2376 = vmatpush.bf16.msrb.mxu1 %v4506_v23  ;;  %v2158_v41 = vadd.f32 %v2157_v48, %v2145_v61  ;;  %v2170_v31 = vpop.f32.mrf.mxu1 }
 0x184   :  { %2389 = vmatpush.bf16.msrb.mxu2 %v4508_v45 }
 0x185   :  { %2402 = vmatpush.bf16.msrb.mxu3 %v4510_v49  ;;  %2364 = vmatmul.bf16.vlgmr.msrb.gmra.mxu0 %v240_v18  ;;  %v2171_v47 = vadd.f32 %v2170_v31, %v2158_v41 }
 0x186   :  { %3606 = vmatpush.msk.msra.mxu0 %vm2415_vm0, %v2461_v1  ;;  %2377 = vmatmul.bf16.vlgmr.msrb.gmra.mxu1 %v241_v24 }
 0x187   :  { %2390 = vmatmul.bf16.vlgmr.msrb.gmra.mxu2 %v242_v25 }
 0x188   :  { %3832 = vmatpush.msk.msra.mxu2 %vm2415_vm0, %v2461_v1  ;;  %2403 = vmatmul.bf16.vlgmr.msrb.gmra.mxu3 %v243_v4 }
 0x18a   :  { %v2183_v32 = vpop.f32.mrf.mxu2  ;;  %v2159_v37 = vpop.f32.mrf.mxu0 }
 0x18b   :  { %v2184_v23 = vadd.f32 %v2183_v32, %v2171_v47  ;;  %v2196_v36 = vpop.f32.mrf.mxu3  ;;  %v2172_v45 = vpop.f32.mrf.mxu1 }
 0x18d   :  { %v2197_v21 = vadd.f32 %v2196_v36, %v2184_v23 }
 0x192   :  { %v2185_v52 = vpop.f32.mrf.mxu2 }
 0x193   :  { %v2198_v49 = vpop.f32.mrf.mxu3 }
 0x1a2   :  { %v2209_v38 = vpop.f32.mrf.mxu0 }
 0x1a3   :  { %v2210_v40 = vadd.f32 %v2209_v38, %v2197_v21  ;;  %v2222_v42 = vpop.f32.mrf.mxu1 }
 0x1a5   :  { %v2223_v43 = vadd.f32 %v2222_v42, %v2210_v40 }
 0x1aa   :  { %v2235_v30 = vpop.f32.mrf.mxu2  ;;  %v2211_v28 = vpop.f32.mrf.mxu0 }
 0x1ab   :  { %v2236_v44 = vadd.f32 %v2235_v30, %v2223_v43  ;;  %v2248_v22 = vpop.f32.mrf.mxu3  ;;  %v2224_v54 = vpop.f32.mrf.mxu1 }
 0x1ad   :  { %v2249_v53 = vadd.f32 %v2248_v22, %v2236_v44 }
 0x1b2   :  { %v2237_v56 = vpop.f32.mrf.mxu2 }
 0x1b3   :  { %v2250_v55 = vpop.f32.mrf.mxu3 }
 0x1c2   :  { %v2261_v20 = vpop.f32.mrf.mxu0 }
 0x1c3   :  { %v2274_v57 = vpop.f32.mrf.mxu1  ;;  %v2262_v1 = vadd.f32 %v2261_v20, %v2249_v53  ;;  %v3886_v20 = vmov 128.0  }
 0x1c4   :  { %3851 = vrcp.f32 %v3886_v20 }
 0x1c5   :  { %v2275_v50 = vadd.f32 %v2274_v57, %v2262_v1 }
 0x1ca   :  { %v2287_v58 = vpop.f32.mrf.mxu2  ;;  %v2263_v60 = vpop.f32.mrf.mxu0 }
 0x1cb   :  { %v2300_v59 = vpop.f32.mrf.mxu3  ;;  %v2276_v62 = vpop.f32.mrf.mxu1  ;;  %v2288_v0 = vadd.f32 %v2287_v58, %v2275_v50 }
 0x1cc   :  { %v3852_v58 = vpop.eup %3851 }
 0x1cd   :  { %v2301_v5 = vadd.f32 %v2300_v59, %v2288_v0  ;;  %v2453_v59 = vmul.f32 128.0, %v3852_v58  ;;  %vm2457_vm4 = vweird.f32 %v3852_v58 }
 0x1cf   :  { %v2454_v62 = vsub.f32 1.0, %v2453_v59 }
 0x1d2   :  { %v2289_v63 = vpop.f32.mrf.mxu2 }
 0x1d3   :  { %v2302_v27 = vpop.f32.mrf.mxu3 }
 0x1e2   :  { %v2313_v26 = vpop.f32.mrf.mxu0 }
 0x1e3   :  { %v2326_v33 = vpop.f32.mrf.mxu1  ;;  %v2314_v6 = vadd.f32 %v2313_v26, %v2301_v5 }
 0x1e5   :  { %v2327_v2 = vadd.f32 %v2326_v33, %v2314_v6  ;;  %v2455_v33 = vmul.f32 %v3852_v58, %v2454_v62 }
 0x1ea   :  { %v2339_v46 = vpop.f32.mrf.mxu2  ;;  %v2315_v35 = vpop.f32.mrf.mxu0 }
 0x1eb   :  { %v2352_v34 = vpop.f32.mrf.mxu3  ;;  %v2328_v51 = vpop.f32.mrf.mxu1  ;;  %v2340_v7 = vadd.f32 %v2339_v46, %v2327_v2  ;;  %v2456_v35 = vadd.f32 %v3852_v58, %v2455_v33 }
 0x1ed   :  { %v2353_v8 = vadd.f32 %v2352_v34, %v2340_v7  ;;  %v2458_v0 = vsel %vm2457_vm4, %v3852_v58, %v2456_v35 }
 0x1f2   :  { %v2341_v19 = vpop.f32.mrf.mxu2 }
 0x1f3   :  { %v2354_v61 = vpop.f32.mrf.mxu3 }
 0x202   :  { %v2365_v9 = vpop.f32.mrf.mxu0 }
 0x203   :  { %v2378_v10 = vpop.f32.mrf.mxu1  ;;  %v2366_v11 = vadd.f32 %v2365_v9, %v2353_v8 }
 0x205   :  { %v2379_v12 = vadd.f32 %v2378_v10, %v2366_v11 }
 0x20a   :  { %v2391_v39 = vpop.f32.mrf.mxu2  ;;  %v2367_v3 = vpop.f32.mrf.mxu0 }
 0x20b   :  { %v2404_v13 = vpop.f32.mrf.mxu3  ;;  %v2392_v14 = vadd.f32 %v2391_v39, %v2379_v12  ;;  %v2380_v15 = vpop.f32.mrf.mxu1 }
 0x20d   :  { %v2405_v18 = vadd.f32 %v2404_v13, %v2392_v14 }
 0x20e   :  { %v2479_v47 = vpop.trf.xlu0 }
 0x20f   :  { %v2408_v24 = vadd.f32 %v2405_v18, %v2095_v17  ;;  %3607 = vmatmul.msk.f32.vlgmr.msra.gmra.mxu0 %vm2495_vm2, %v2479_v47 }
 0x211   :  { %2409 = vst [vmem:[#allocation3] sm:$0x3] %v2408_v24 }
 0x212   :  { %v2393_v25 = vpop.f32.mrf.mxu2 }
 0x213   :  { %v2406_v4 = vpop.f32.mrf.mxu3 }
 0x216   :  { %v2480_v21 = vpop.trf.xlu0 }
 0x217   :  { %3608 = vmatmul.msk.f32.gmra.mxu0 %vm2495_vm2, %v2480_v21 }
 0x218   :  { %v2414_v48 = vld [vmem:[#allocation3] sm:$0x3] }
 0x219   :  { %v2431_v41 = vsel %vm2415_vm0, %v2414_v48, 0.0 }
 0x21a   :  { %v2432_v31 = vrot.slane %v2431_v41, 4 }
 0x21c   :  { %v2433_v32 = vadd.f32 %v2432_v31, %v2431_v41 }
 0x21e   :  { %v2434_v23 = vrot.slane %v2433_v32, 2  ;;  %v2481_v42 = vpop.trf.xlu0 }
 0x21f   :  { %3609 = vmatmul.msk.f32.gmra.mxu0 %vm2495_vm2, %v2481_v42 }
 0x220   :  { %v2435_v36 = vadd.f32 %v2434_v23, %v2433_v32 }
 0x222   :  { %v2436_v37 = vrot.slane %v2435_v36, 1 }
 0x224   :  { %v2437_v45 = vadd.f32 %v2436_v37, %v2435_v36 }
 0x226   :  { %v2438_v52 = vmul.f32 %v2437_v45, %v4747_v29  ;;  %v2482_v30 = vpop.trf.xlu0 }
 0x227   :  { %3610 = vmatmul.msk.f32.gmra.mxu0 %vm2495_vm2, %v2482_v30 }
 0x228   :  { %v2462_v49 = vsub.f32 %v2414_v48, %v2438_v52  ;;  %v2439_v38 = vsub.f32 %v4752_v16, %v2438_v52 }
 0x22a   :  { %3623 = vmatpush.msk.msra.mxu1 %vm2415_vm0, %v2462_v49  ;;  %3833 = vmatpush.msk.msra.mxu3 %vm2415_vm0, %v2462_v49  ;;  %v2440_v40 = vmul.f32 %v2439_v38, %v2439_v38 }
 0x22b   :  { %2612 = vxpose.xlu0.b32.start.end [1/1] (short) %v2462_v49, 128 }
 0x22c   :  { %v2442_v43 = vsel %vm2441_vm3, %v2440_v40, 0.0 }
 0x22d   :  { %2443 = vadd.xlane.f32.xlu1 %v2442_v43 }
 0x22e   :  { %v2483_v44 = vpop.trf.xlu0 }
 0x22f   :  { %3611 = vmatmul.msk.f32.gmra.mxu0 %vm2495_vm2, %v2483_v44 }
 0x236   :  { %v2484_v29 = vpop.trf.xlu0 }
 0x237   :  { %3612 = vmatmul.msk.f32.gmra.mxu0 %vm2495_vm2, %v2484_v29 }
 0x23e   :  { %v2485_v16 = vpop.trf.xlu0 }
 0x23f   :  { %3613 = vmatmul.msk.f32.gmra.mxu0 %vm2495_vm2, %v2485_v16 }
 0x246   :  { %v2486_v22 = vpop.trf.xlu0 }
 0x247   :  { %3614 = vmatmul.msk.f32.gmra.mxu0 %vm2495_vm2, %v2486_v22 }
 0x24e   :  { %v2487_v28 = vpop.trf.xlu0 }
 0x24f   :  { %3615 = vmatmul.msk.f32.vlgmr.msra.gmra.mxu2 %vm2495_vm2, %v2487_v28 }
 0x256   :  { %v2488_v53 = vpop.trf.xlu0 }
 0x257   :  { %3616 = vmatmul.msk.f32.gmra.mxu2 %vm2495_vm2, %v2488_v53 }
 0x25e   :  { %v2489_v54 = vpop.trf.xlu0 }
 0x25f   :  { %3617 = vmatmul.msk.f32.gmra.mxu2 %vm2495_vm2, %v2489_v54 }
 0x266   :  { %v2490_v56 = vpop.trf.xlu0 }
 0x267   :  { %3618 = vmatmul.msk.f32.gmra.mxu2 %vm2495_vm2, %v2490_v56 }
 0x26e   :  { %v2491_v55 = vpop.trf.xlu0 }
 0x26f   :  { %3619 = vmatmul.msk.f32.gmra.mxu2 %vm2495_vm2, %v2491_v55 }
 0x276   :  { %v2492_v57 = vpop.trf.xlu0 }
 0x277   :  { %3620 = vmatmul.msk.f32.gmra.mxu2 %vm2495_vm2, %v2492_v57 }
 0x27e   :  { %v2493_v60 = vpop.trf.xlu0 }
 0x27f   :  { %3621 = vmatmul.msk.f32.gmra.mxu2 %vm2495_vm2, %v2493_v60 }
 0x286   :  { %v2494_v1 = vpop.trf.xlu0 }
 0x287   :  { %3622 = vmatmul.msk.f32.gmra.mxu2 %vm2495_vm2, %v2494_v1 }
 0x28c   :  { %v2564_v24 = vpop.f32.mrf.mxu0 }
 0x294   :  { %v2567_v4 = vpop.f32.mrf.mxu0 }
 0x29c   :  { %v2570_v41 = vpop.f32.mrf.mxu0 }
 0x2a0   :  { %v2444_v63 = vpop.xlane.xlu1 %2443 }
 0x2a1   :  { %v2445_v27 = vrot.slane %v2444_v63, 4 }
 0x2a3   :  { %v2446_v26 = vadd.f32 %v2445_v27, %v2444_v63 }
 0x2a4   :  { %v2573_v32 = vpop.f32.mrf.mxu0 }
 0x2a5   :  { %v2447_v46 = vrot.slane %v2446_v26, 2 }
 0x2a7   :  { %v2448_v34 = vadd.f32 %v2447_v46, %v2446_v26 }
 0x2a9   :  { %v2449_v51 = vrot.slane %v2448_v34, 1 }
 0x2ab   :  { %v2450_v50 = vadd.f32 %v2449_v51, %v2448_v34 }
 0x2ac   :  { %v2576_v21 = vpop.f32.mrf.mxu0 }
 0x2ad   :  { %3834 = vpush %v2450_v50 }
 0x2ae   :  { %3836 = vpush %v2458_v0 }
 0x2b4   :  { %v2579_v38 = vpop.f32.mrf.mxu0 }
 0x2bc   :  { %v2582_v29 = vpop.f32.mrf.mxu0 }
 0x2c4   :  { %v2585_v33 = vpop.f32.mrf.mxu0 }
 0x2cf   :  { %v2628_v19 = vpop.trf.xlu0 }
 0x2d0   :  { %3624 = vmatmul.msk.f32.vlgmr.msra.gmra.mxu1 %vm2495_vm2, %v2628_v19 }
 0x2d2   :  { %v2588_v31 = vpop.f32.mrf.mxu2 }
 0x2d7   :  { %v2629_v61 = vpop.trf.xlu0 }
 0x2d8   :  { %3625 = vmatmul.msk.f32.gmra.mxu1 %vm2495_vm2, %v2629_v61 }
 0x2da   :  { %v2591_v23 = vpop.f32.mrf.mxu2 }
 0x2de   :  { %s3835_s1 = spop %3834 }
 0x2df   :  { %v2630_v5 = vpop.trf.xlu0  ;;  %s3837_s18 = spop %3836 }
 0x2e0   :  { %s2460_s19 = smul.f32 %s3837_s18, %s3835_s1  ;;  %3626 = vmatmul.msk.f32.gmra.mxu1 %vm2495_vm2, %v2630_v5 }
 0x2e2   :  { %v2825_v6 = vstv %s2460_s19  ;;  %v2594_v45 = vpop.f32.mrf.mxu2 }
 0x2e3   :  { %2826 = vst [vmem:[%s4823_s3] sm:$0xff] %v2825_v6 }
 0x2e7   :  { %v2631_v2 = vpop.trf.xlu0 }
 0x2e8   :  { %3627 = vmatmul.msk.f32.gmra.mxu1 %vm2495_vm2, %v2631_v2 }
 0x2ea   :  { %v2597_v40 = vpop.f32.mrf.mxu2 }
 0x2ef   :  { %v2632_v7 = vpop.trf.xlu0 }
 0x2f0   :  { %3628 = vmatmul.msk.f32.gmra.mxu1 %vm2495_vm2, %v2632_v7 }
 0x2f2   :  { %v2600_v16 = vpop.f32.mrf.mxu2 }
 0x2f7   :  { %v2633_v8 = vpop.trf.xlu0 }
 0x2f8   :  { %3629 = vmatmul.msk.f32.gmra.mxu1 %vm2495_vm2, %v2633_v8 }
 0x2fa   :  { %v2603_v46 = vpop.f32.mrf.mxu2 }
 0x2ff   :  { %v2634_v9 = vpop.trf.xlu0 }
 0x300   :  { %3630 = vmatmul.msk.f32.gmra.mxu1 %vm2495_vm2, %v2634_v9 }
 0x307   :  { %v2635_v10 = vpop.trf.xlu0 }
 0x308   :  { %3631 = vmatmul.msk.f32.gmra.mxu1 %vm2495_vm2, %v2635_v10 }
 0x30f   :  { %v2636_v11 = vpop.trf.xlu0 }
 0x310   :  { %3632 = vmatmul.msk.f32.vlgmr.msra.gmra.mxu3 %vm2495_vm2, %v2636_v11 }
 0x317   :  { %v2637_v12 = vpop.trf.xlu0 }
 0x318   :  { %3633 = vmatmul.msk.f32.gmra.mxu3 %vm2495_vm2, %v2637_v12  ;;  %v2606_v12 = vpop.f32.mrf.mxu2 }
 0x31f   :  { %v2638_v39 = vpop.trf.xlu0 }
 0x320   :  { %3634 = vmatmul.msk.f32.gmra.mxu3 %vm2495_vm2, %v2638_v39 }
 0x327   :  { %v2639_v13 = vpop.trf.xlu0 }
 0x328   :  { %3635 = vmatmul.msk.f32.gmra.mxu3 %vm2495_vm2, %v2639_v13 }
 0x32f   :  { %v2640_v14 = vpop.trf.xlu0 }
 0x330   :  { %3636 = vmatmul.msk.f32.gmra.mxu3 %vm2495_vm2, %v2640_v14 }
 0x337   :  { %v2641_v3 = vpop.trf.xlu0 }
 0x338   :  { %3637 = vmatmul.msk.f32.gmra.mxu3 %vm2495_vm2, %v2641_v3 }
 0x33f   :  { %v2642_v15 = vpop.trf.xlu0 }
 0x340   :  { %3638 = vmatmul.msk.f32.gmra.mxu3 %vm2495_vm2, %v2642_v15 }
 0x347   :  { %v2643_v17 = vpop.trf.xlu0 }
 0x348   :  { %3639 = vmatmul.msk.f32.gmra.mxu3 %vm2495_vm2, %v2643_v17 }
 0x34d   :  { %v2712_v18 = vpop.f32.mrf.mxu1 }
 0x34e   :  { %v2760_v22 = vsub.f32 %v2564_v24, %v2712_v18 }
 0x350   :  { %v2776_v56 = vmul.f32 %v2760_v22, %v2760_v22 }
 0x355   :  { %v2715_v25 = vpop.f32.mrf.mxu1 }
 0x356   :  { %v2761_v44 = vsub.f32 %v2567_v4, %v2715_v25 }
 0x358   :  { %v2777_v53 = vmul.f32 %v2761_v44, %v2761_v44 }
 0x35a   :  { %v2792_v58 = vadd.f32 %v2777_v53, %v2776_v56 }
 0x35d   :  { %v2718_v48 = vpop.f32.mrf.mxu1 }
 0x35e   :  { %v2762_v28 = vsub.f32 %v2570_v41, %v2718_v48 }
 0x360   :  { %v2778_v55 = vmul.f32 %v2762_v28, %v2762_v28 }
 0x362   :  { %v2793_v63 = vadd.f32 %v2792_v58, %v2778_v55 }
 0x365   :  { %v2721_v47 = vpop.f32.mrf.mxu1 }
 0x366   :  { %v2763_v54 = vsub.f32 %v2573_v32, %v2721_v47  ;;  %v2609_v32 = vpop.f32.mrf.mxu2 }
 0x368   :  { %v2779_v59 = vmul.f32 %v2763_v54, %v2763_v54 }
 0x36a   :  { %v2794_v1 = vadd.f32 %v2793_v63, %v2779_v59 }
 0x36d   :  { %v2724_v37 = vpop.f32.mrf.mxu1 }
 0x36e   :  { %v2764_v20 = vsub.f32 %v2576_v21, %v2724_v37 }
 0x370   :  { %v2780_v27 = vmul.f32 %v2764_v20, %v2764_v20 }
 0x372   :  { %v2795_v51 = vadd.f32 %v2794_v1, %v2780_v27 }
 0x375   :  { %v2727_v49 = vpop.f32.mrf.mxu1 }
 0x376   :  { %v2765_v60 = vsub.f32 %v2579_v38, %v2727_v49  ;;  %v3887_v49 = vmov 16384.0  }
 0x377   :  { %3853 = vrcp.f32 %v3887_v49 }
 0x378   :  { %v2781_v34 = vmul.f32 %v2765_v60, %v2765_v60 }
 0x37a   :  { %v2796_v61 = vadd.f32 %v2795_v51, %v2781_v34 }
 0x37d   :  { %v2730_v43 = vpop.f32.mrf.mxu1  ;;  %v3854_v38 = vpop.eup %3853 }
 0x37e   :  { %v2766_v26 = vsub.f32 %v2582_v29, %v2730_v43  ;;  %vm2821_vm5 = vweird.f32 %v3854_v38 }
 0x380   :  { %v2782_v50 = vmul.f32 %v2766_v26, %v2766_v26 }
 0x382   :  { %v2797_v2 = vadd.f32 %v2796_v61, %v2782_v50 }
 0x385   :  { %v2733_v62 = vpop.f32.mrf.mxu1 }
 0x386   :  { %v2767_v35 = vsub.f32 %v2585_v33, %v2733_v62 }
 0x388   :  { %v2783_v5 = vmul.f32 %v2767_v35, %v2767_v35 }
 0x38a   :  { %v2798_v9 = vadd.f32 %v2797_v2, %v2783_v5 }
 0x393   :  { %v2736_v36 = vpop.f32.mrf.mxu3 }
 0x394   :  { %v2768_v0 = vsub.f32 %v2588_v31, %v2736_v36 }
 0x396   :  { %v2784_v7 = vmul.f32 %v2768_v0, %v2768_v0 }
 0x398   :  { %v2799_v39 = vadd.f32 %v2798_v9, %v2784_v7 }
 0x39b   :  { %v2739_v52 = vpop.f32.mrf.mxu3 }
 0x39c   :  { %v2769_v6 = vsub.f32 %v2591_v23, %v2739_v52 }
 0x39e   :  { %v2785_v10 = vmul.f32 %v2769_v6, %v2769_v6 }
 0x3a0   :  { %v2800_v15 = vadd.f32 %v2799_v39, %v2785_v10 }
 0x3a3   :  { %v2742_v42 = vpop.f32.mrf.mxu3 }
 0x3a4   :  { %v2770_v8 = vsub.f32 %v2594_v45, %v2742_v42 }
 0x3a6   :  { %v2786_v13 = vmul.f32 %v2770_v8, %v2770_v8 }
 0x3a8   :  { %v2801_v24 = vadd.f32 %v2800_v15, %v2786_v13 }
 0x3ab   :  { %v2745_v30 = vpop.f32.mrf.mxu3 }
 0x3ac   :  { %v2771_v11 = vsub.f32 %v2597_v40, %v2745_v30  ;;  %v2817_v40 = vmul.f32 16384.0, %v3854_v38 }
 0x3ae   :  { %v2787_v17 = vmul.f32 %v2771_v11, %v2771_v11  ;;  %v2818_v42 = vsub.f32 1.0, %v2817_v40 }
 0x3b0   :  { %v2802_v48 = vadd.f32 %v2801_v24, %v2787_v17  ;;  %v2819_v29 = vmul.f32 %v3854_v38, %v2818_v42 }
 0x3b2   :  { %v2820_v28 = vadd.f32 %v3854_v38, %v2819_v29 }
 0x3b3   :  { %v2748_v57 = vpop.f32.mrf.mxu3 }
 0x3b4   :  { %v2772_v14 = vsub.f32 %v2600_v16, %v2748_v57  ;;  %v2822_v56 = vsel %vm2821_vm5, %v3854_v38, %v2820_v28 }
 0x3b6   :  { %v2788_v25 = vmul.f32 %v2772_v14, %v2772_v14 }
 0x3b8   :  { %v2803_v31 = vadd.f32 %v2802_v48, %v2788_v25 }
 0x3bb   :  { %v2751_v19 = vpop.f32.mrf.mxu3 }
 0x3bc   :  { %v2773_v18 = vsub.f32 %v2603_v46, %v2751_v19 }
 0x3be   :  { %v2789_v41 = vmul.f32 %v2773_v18, %v2773_v18 }
 0x3c0   :  { %v2804_v36 = vadd.f32 %v2803_v31, %v2789_v41 }
 0x3c3   :  { %v2754_v3 = vpop.f32.mrf.mxu3 }
 0x3c4   :  { %v2774_v4 = vsub.f32 %v2606_v12, %v2754_v3 }
 0x3c6   :  { %v2790_v47 = vmul.f32 %v2774_v4, %v2774_v4 }
 0x3c8   :  { %v2805_v21 = vadd.f32 %v2804_v36, %v2790_v47 }
 0x3cb   :  { %v2757_v23 = vpop.f32.mrf.mxu3 }
 0x3cc   :  { %v2775_v37 = vsub.f32 %v2609_v32, %v2757_v23 }
 0x3ce   :  { %v2791_v45 = vmul.f32 %v2775_v37, %v2775_v37 }
 0x3d0   :  { %v2806_v52 = vadd.f32 %v2805_v21, %v2791_v45 }
 0x3d2   :  { %2807 = vadd.xlane.f32.xlu1 %v2806_v52 }
 0x445   :  { %v2808_v43 = vpop.xlane.xlu1 %2807 }
 0x446   :  { %v2809_v30 = vrot.slane %v2808_v43, 4 }
 0x448   :  { %v2810_v44 = vadd.f32 %v2809_v30, %v2808_v43 }
 0x44a   :  { %v2811_v16 = vrot.slane %v2810_v44, 2 }
 0x44c   :  { %v2812_v22 = vadd.f32 %v2811_v16, %v2810_v44 }
 0x44e   :  { %v2813_v53 = vrot.slane %v2812_v22, 1 }
 0x450   :  { %v2814_v54 = vadd.f32 %v2813_v53, %v2812_v22 }
 0x452   :  { %3838 = vpush %v2814_v54 }
 0x453   :  { %3840 = vpush %v2822_v56 }
 0x483   :  { %s3839_s3 = spop %3838 }
 0x484   :  { %s3841_s2 = spop %3840 }
 0x485   :  { %s2824_s22 = smul.f32 %s3841_s2, %s3839_s3 }
 0x487   :  { %v2827_v55 = vstv %s2824_s22 }
 0x488   :  { %2828 = vst [vmem:[%s4824_s4] sm:$0xff] %v2827_v55 }
 0x489   :  { %2837 = vsyncpa [#allocation5], 1 }

</bundles_post_ra>
